<compile_context>
chip_gen: v6e
topology: v6e:2x2x1
jax: 0.10.0
libtpu: 0.0.40
codegen_flags: <defaults>
</compile_context>

<pallas_src>
import functools
import jax
import jax.numpy as jnp
from jax.experimental import pallas as pl
from jax.experimental.pallas import tpu as pltpu


HEAD_PAD = 128  # lane-dense padded width for the head output / template


# --------------------------------------------------------------------------
# Fused kernel: embedding(pcd) -> MLP -> embedding(mv) -> MLP2 -> upsample
#               -> head -> + template, all in VMEM.
# --------------------------------------------------------------------------
def fused_forward_kernel(
        pcd_ref, mv_ref,
        emb_w1_ref, emb_b1_ref, emb_w2_ref, emb_b2_ref,
        mlp_w1_ref, mlp_b1_ref, mlp_w2_ref, mlp_b2_ref,
        mlp2_w1_ref, mlp2_b1_ref, mlp2_w2_ref, mlp2_b2_ref,
        up_wa_ref, up_wb_ref, up_b_ref,
        head_w1_ref, head_b1_ref, head_w2_ref, head_b2_ref,
        tmpl_ref,
        out_ref,
        *, batch):
    emb_w1 = emb_w1_ref[...]          # (3, 64)
    emb_b1 = emb_b1_ref[...]          # (1, 64)
    emb_w2 = emb_w2_ref[...]          # (64, 128)
    emb_b2 = emb_b2_ref[...]          # (1, 128)

    def embed_pool(x):                # x: (B*Np, 3) -> (B, 128)
        # First 1x1-conv layer (Cin=3) on the VPU: three broadcast FMAs.
        # Equivalent to dot(x, emb_w1) but keeps the MXU free and avoids a
        # lane-sparse K=3 operand.
        h = (x[:, 0:1] * emb_w1[0:1, :]
             + x[:, 1:2] * emb_w1[1:2, :]
             + x[:, 2:3] * emb_w1[2:3, :]) + emb_b1
        h = jnp.maximum(h, 0.0)                                           # (B*Np, 64)
        f = jnp.dot(h, emb_w2, preferred_element_type=jnp.float32) + emb_b2
        f = jnp.maximum(f, 0.0)                                           # (B*Np, 128)
        n_pts = f.shape[0] // batch
        # Segmented global max-pool over points (n_pts is a multiple of 8,
        # so the sublane-split reshape is layout-free).
        return jnp.max(f.reshape(batch, n_pts, f.shape[1]), axis=1)       # (B, 128)

    def mlp2(x, w1, b1, w2, b2):
        h = jnp.maximum(jnp.dot(x, w1, preferred_element_type=jnp.float32) + b1, 0.0)
        return jnp.maximum(jnp.dot(h, w2, preferred_element_type=jnp.float32) + b2, 0.0)

    # pcd branch
    pcd_feat = embed_pool(pcd_ref[...])                                   # (B, 128)
    pcd_feat = mlp2(pcd_feat, mlp_w1_ref[...], mlp_b1_ref[...],
                    mlp_w2_ref[...], mlp_b2_ref[...])                     # (B, 128)

    # mv_points branch
    ds_feat = embed_pool(mv_ref[...])                                     # (B, 128)
    ds_feat = mlp2(ds_feat, mlp2_w1_ref[...], mlp2_b1_ref[...],
                   mlp2_w2_ref[...], mlp2_b2_ref[...])                    # (B, 128)

    # UpSample without concat: concat([p, d]) @ W == p @ W[:128] + d @ W[128:]
    temp = (jnp.dot(pcd_feat, up_wa_ref[...], preferred_element_type=jnp.float32)
            + jnp.dot(ds_feat, up_wb_ref[...], preferred_element_type=jnp.float32)
            + up_b_ref[...])
    temp = jnp.maximum(temp, 0.0)                                         # (B, 128)

    # MLP head (padded to 128 output lanes) fused with the template residual.
    h = jnp.maximum(
        jnp.dot(temp, head_w1_ref[...], preferred_element_type=jnp.float32)
        + head_b1_ref[...], 0.0)                                          # (B, 256)
    y = jnp.dot(h, head_w2_ref[...], preferred_element_type=jnp.float32) + head_b2_ref[...]
    out_ref[...] = y + tmpl_ref[...]                                      # (B, 128) unmasked store


# --------------------------------------------------------------------------
# Wrapper
# --------------------------------------------------------------------------
def model_forward(params, pcd, mv_points):
    """pcd: (B, N, 3) float32   mv_points: (B, Nm, 3) float32 -> (B, M, 3)."""
    B, N, _ = pcd.shape
    Nm = mv_points.shape[1]
    m_ctrl = params["template"].shape[1]
    cp_num = m_ctrl * 3

    # (PyTorch transposes to NCL for Conv1d; channels-last is used directly and
    # the point clouds are flattened so the shared per-point MLP runs as one
    # big matmul per layer.)
    pcd_flat = pcd.reshape(B * N, 3)
    mv_flat = mv_points.reshape(B * Nm, 3)

    n_inputs = 22
    vmem_spec = pl.BlockSpec(memory_space=pltpu.MemorySpace.VMEM)

    out_pad = pl.pallas_call(
        functools.partial(fused_forward_kernel, batch=B),
        out_shape=jax.ShapeDtypeStruct((B, HEAD_PAD), jnp.float32),
        in_specs=[vmem_spec] * n_inputs,
        out_specs=vmem_spec,
    )(pcd_flat, mv_flat,
      params["emb_w1"], params["emb_b1"], params["emb_w2"], params["emb_b2"],
      params["mlp_w1"], params["mlp_b1"], params["mlp_w2"], params["mlp_b2"],
      params["mlp2_w1"], params["mlp2_b1"], params["mlp2_w2"], params["mlp2_b2"],
      params["up_wa"], params["up_wb"], params["up_b"],
      params["head_w1"], params["head_b1"], params["head_w2_pad"], params["head_b2_pad"],
      params["template_pad"])

    # slice off the lane padding, then rearrange 'B (M N) -> B M N', N=3
    return out_pad[:, :cp_num].reshape(B, m_ctrl, 3)


# --------------------------------------------------------------------------
# Parameter construction (deterministic, synthetic)
# --------------------------------------------------------------------------
def init_params(key, m_ctrl):
    cp_num = m_ctrl * 3

    def dense(key, fan_in, fan_out):
        kw, kb = jax.random.split(key)
        lim = 1.0 / jnp.sqrt(fan_in)
        w = jax.random.uniform(kw, (fan_in, fan_out), jnp.float32, -lim, lim)
        b = jax.random.uniform(kb, (1, fan_out), jnp.float32, -lim, lim)
        return w, b

    keys = jax.random.split(key, 16)
    p = {}
    # Embedding_: shared per-point MLP 3 -> 64 -> 128
    p["emb_w1"], p["emb_b1"] = dense(keys[0], 3, 64)
    p["emb_w2"], p["emb_b2"] = dense(keys[1], 64, 128)
    # simple_mlp: 128 -> 256 -> 128
    p["mlp_w1"], p["mlp_b1"] = dense(keys[2], 128, 256)
    p["mlp_w2"], p["mlp_b2"] = dense(keys[3], 256, 128)
    # simple_mlp_: 128 -> 256 -> 128
    p["mlp2_w1"], p["mlp2_b1"] = dense(keys[4], 128, 256)
    p["mlp2_w2"], p["mlp2_b2"] = dense(keys[5], 256, 128)
    # UpSample: 256 -> 128, weight pre-split into the two concat halves
    up_w, p["up_b"] = dense(keys[6], 256, 128)
    p["up_wa"] = up_w[:128, :]     # acts on pcd_feature
    p["up_wb"] = up_w[128:, :]     # acts on ds_feature
    # MLP_Head: 128 -> 256 -> cp_num (output padded to a lane-dense 128)
    p["head_w1"], p["head_b1"] = dense(keys[7], 128, 256)
    head_w2, head_b2 = dense(keys[8], 256, cp_num)
    p["head_w2_pad"] = jnp.zeros((256, HEAD_PAD), jnp.float32).at[:, :cp_num].set(head_w2)
    p["head_b2_pad"] = jnp.zeros((1, HEAD_PAD), jnp.float32).at[:, :cp_num].set(head_b2)
    # template_params buffer (1, M, 3) plus its flattened, lane-padded form
    p["template"] = jax.random.normal(keys[9], (1, m_ctrl, 3), jnp.float32)
    p["template_pad"] = jnp.zeros((1, HEAD_PAD), jnp.float32).at[:, :cp_num].set(
        p["template"].reshape(1, cp_num))
    return p


# --------------------------------------------------------------------------
if __name__ == "__main__":
    key = jax.random.PRNGKey(0)
    k_params, k_pcd, k_mv = jax.random.split(key, 3)

    B = 2          # batch
    N = 64         # points in the dense cloud
    Nm = 32        # multi-view / downsampled points
    M_CTRL = 8     # control points in the template -> cp_num = 24

    params = init_params(k_params, M_CTRL)
    pcd = jax.random.normal(k_pcd, (B, N, 3), jnp.float32)
    mv_points = jax.random.normal(k_mv, (B, Nm, 3), jnp.float32)

    out = jax.jit(model_forward)(params, pcd, mv_points)
    out = jax.block_until_ready(out)

    assert out.shape == (B, M_CTRL, 3), out.shape
    assert out.dtype == jnp.float32
    assert bool(jnp.all(jnp.isfinite(out)))
    print("KERNEL_OK")
</pallas_src>

<mosaic_0001>
module attributes {stable_mosaic.version = 11 : i64} {
  func.func @fused_forward_kernel(%arg0: memref<128x3xf32, #tpu.memory_space<vmem>>, %arg1: memref<64x3xf32, #tpu.memory_space<vmem>>, %arg2: memref<3x64xf32, #tpu.memory_space<vmem>>, %arg3: memref<1x64xf32, #tpu.memory_space<vmem>>, %arg4: memref<64x128xf32, #tpu.memory_space<vmem>>, %arg5: memref<1x128xf32, #tpu.memory_space<vmem>>, %arg6: memref<128x256xf32, #tpu.memory_space<vmem>>, %arg7: memref<1x256xf32, #tpu.memory_space<vmem>>, %arg8: memref<256x128xf32, #tpu.memory_space<vmem>>, %arg9: memref<1x128xf32, #tpu.memory_space<vmem>>, %arg10: memref<128x256xf32, #tpu.memory_space<vmem>>, %arg11: memref<1x256xf32, #tpu.memory_space<vmem>>, %arg12: memref<256x128xf32, #tpu.memory_space<vmem>>, %arg13: memref<1x128xf32, #tpu.memory_space<vmem>>, %arg14: memref<128x128xf32, #tpu.memory_space<vmem>>, %arg15: memref<128x128xf32, #tpu.memory_space<vmem>>, %arg16: memref<1x128xf32, #tpu.memory_space<vmem>>, %arg17: memref<128x256xf32, #tpu.memory_space<vmem>>, %arg18: memref<1x256xf32, #tpu.memory_space<vmem>>, %arg19: memref<256x128xf32, #tpu.memory_space<vmem>>, %arg20: memref<1x128xf32, #tpu.memory_space<vmem>>, %arg21: memref<1x128xf32, #tpu.memory_space<vmem>>, %arg22: memref<2x128xf32, #tpu.memory_space<vmem>>) attributes {dimension_semantics = [], scalar_prefetch = 0 : i64, scratch_operands = 0 : i64, tpu.core_type = #tpu.core_type<tc>} {
    %c0 = arith.constant 0 : index
    %c0_0 = arith.constant 0 : index
    %0 = vector.load %arg2[%c0, %c0_0] : memref<3x64xf32, #tpu.memory_space<vmem>>, vector<3x64xf32>
    %c0_1 = arith.constant 0 : index
    %c0_2 = arith.constant 0 : index
    %1 = vector.load %arg3[%c0_1, %c0_2] : memref<1x64xf32, #tpu.memory_space<vmem>>, vector<1x64xf32>
    %c0_3 = arith.constant 0 : index
    %c0_4 = arith.constant 0 : index
    %2 = vector.load %arg4[%c0_3, %c0_4] : memref<64x128xf32, #tpu.memory_space<vmem>>, vector<64x128xf32>
    %c0_5 = arith.constant 0 : index
    %c0_6 = arith.constant 0 : index
    %3 = vector.load %arg5[%c0_5, %c0_6] : memref<1x128xf32, #tpu.memory_space<vmem>>, vector<1x128xf32>
    %c0_7 = arith.constant 0 : index
    %c0_8 = arith.constant 0 : index
    %4 = vector.load %arg0[%c0_7, %c0_8] : memref<128x3xf32, #tpu.memory_space<vmem>>, vector<128x3xf32>
    %5 = vector.extract_strided_slice %4 {offsets = [0, 0], sizes = [128, 1], strides = [1, 1]} : vector<128x3xf32> to vector<128x1xf32>
    %6 = vector.extract_strided_slice %0 {offsets = [0, 0], sizes = [1, 64], strides = [1, 1]} : vector<3x64xf32> to vector<1x64xf32>
    %7 = vector.broadcast %5 : vector<128x1xf32> to vector<128x64xf32>
    %8 = vector.broadcast %6 : vector<1x64xf32> to vector<128x64xf32>
    %9 = arith.mulf %7, %8 : vector<128x64xf32>
    %10 = vector.extract_strided_slice %4 {offsets = [0, 1], sizes = [128, 1], strides = [1, 1]} : vector<128x3xf32> to vector<128x1xf32>
    %11 = vector.extract_strided_slice %0 {offsets = [1, 0], sizes = [1, 64], strides = [1, 1]} : vector<3x64xf32> to vector<1x64xf32>
    %12 = vector.broadcast %10 : vector<128x1xf32> to vector<128x64xf32>
    %13 = vector.broadcast %11 : vector<1x64xf32> to vector<128x64xf32>
    %14 = arith.mulf %12, %13 : vector<128x64xf32>
    %15 = arith.addf %9, %14 : vector<128x64xf32>
    %16 = vector.extract_strided_slice %4 {offsets = [0, 2], sizes = [128, 1], strides = [1, 1]} : vector<128x3xf32> to vector<128x1xf32>
    %17 = vector.extract_strided_slice %0 {offsets = [2, 0], sizes = [1, 64], strides = [1, 1]} : vector<3x64xf32> to vector<1x64xf32>
    %18 = vector.broadcast %16 : vector<128x1xf32> to vector<128x64xf32>
    %19 = vector.broadcast %17 : vector<1x64xf32> to vector<128x64xf32>
    %20 = arith.mulf %18, %19 : vector<128x64xf32>
    %21 = arith.addf %15, %20 : vector<128x64xf32>
    %22 = vector.broadcast %1 : vector<1x64xf32> to vector<128x64xf32>
    %23 = arith.addf %21, %22 : vector<128x64xf32>
    %cst = arith.constant 0.000000e+00 : f32
    %24 = vector.broadcast %cst : f32 to vector<128x64xf32>
    %25 = arith.maximumf %23, %24 : vector<128x64xf32>
    %cst_9 = arith.constant dense<0.000000e+00> : vector<128x128xf32>
    %26 = tpu.matmul %25, %2, %cst_9 {dimension_numbers = #tpu.dot_dimension_numbers<[1], [0], [0], [1], [0, 0, 1, 1], [], []>} : vector<128x64xf32>, vector<64x128xf32>, vector<128x128xf32> -> vector<128x128xf32>
    %27 = vector.broadcast %3 : vector<1x128xf32> to vector<128x128xf32>
    %28 = arith.addf %26, %27 : vector<128x128xf32>
    %cst_10 = arith.constant 0.000000e+00 : f32
    %29 = vector.broadcast %cst_10 : f32 to vector<128x128xf32>
    %30 = arith.maximumf %28, %29 : vector<128x128xf32>
    %31 = vector.shape_cast %30 : vector<128x128xf32> to vector<2x64x128xf32>
    %cst_11 = arith.constant dense<0xFF800000> : vector<2x128xf32>
    %32 = vector.multi_reduction <maximumf>, %31, %cst_11 [1] : vector<2x64x128xf32> to vector<2x128xf32>
    %c0_12 = arith.constant 0 : index
    %c0_13 = arith.constant 0 : index
    %33 = vector.load %arg6[%c0_12, %c0_13] : memref<128x256xf32, #tpu.memory_space<vmem>>, vector<128x256xf32>
    %c0_14 = arith.constant 0 : index
    %c0_15 = arith.constant 0 : index
    %34 = vector.load %arg7[%c0_14, %c0_15] : memref<1x256xf32, #tpu.memory_space<vmem>>, vector<1x256xf32>
    %c0_16 = arith.constant 0 : index
    %c0_17 = arith.constant 0 : index
    %35 = vector.load %arg8[%c0_16, %c0_17] : memref<256x128xf32, #tpu.memory_space<vmem>>, vector<256x128xf32>
    %c0_18 = arith.constant 0 : index
    %c0_19 = arith.constant 0 : index
    %36 = vector.load %arg9[%c0_18, %c0_19] : memref<1x128xf32, #tpu.memory_space<vmem>>, vector<1x128xf32>
    %cst_20 = arith.constant dense<0.000000e+00> : vector<2x256xf32>
    %37 = tpu.matmul %32, %33, %cst_20 {dimension_numbers = #tpu.dot_dimension_numbers<[1], [0], [0], [1], [0, 0, 1, 1], [], []>} : vector<2x128xf32>, vector<128x256xf32>, vector<2x256xf32> -> vector<2x256xf32>
    %38 = vector.broadcast %34 : vector<1x256xf32> to vector<2x256xf32>
    %39 = arith.addf %37, %38 : vector<2x256xf32>
    %cst_21 = arith.constant 0.000000e+00 : f32
    %40 = vector.broadcast %cst_21 : f32 to vector<2x256xf32>
    %41 = arith.maximumf %39, %40 : vector<2x256xf32>
    %cst_22 = arith.constant dense<0.000000e+00> : vector<2x128xf32>
    %42 = tpu.matmul %41, %35, %cst_22 {dimension_numbers = #tpu.dot_dimension_numbers<[1], [0], [0], [1], [0, 0, 1, 1], [], []>} : vector<2x256xf32>, vector<256x128xf32>, vector<2x128xf32> -> vector<2x128xf32>
    %43 = vector.broadcast %36 : vector<1x128xf32> to vector<2x128xf32>
    %44 = arith.addf %42, %43 : vector<2x128xf32>
    %cst_23 = arith.constant 0.000000e+00 : f32
    %45 = vector.broadcast %cst_23 : f32 to vector<2x128xf32>
    %46 = arith.maximumf %44, %45 : vector<2x128xf32>
    %c0_24 = arith.constant 0 : index
    %c0_25 = arith.constant 0 : index
    %47 = vector.load %arg1[%c0_24, %c0_25] : memref<64x3xf32, #tpu.memory_space<vmem>>, vector<64x3xf32>
    %48 = vector.extract_strided_slice %47 {offsets = [0, 0], sizes = [64, 1], strides = [1, 1]} : vector<64x3xf32> to vector<64x1xf32>
    %49 = vector.extract_strided_slice %0 {offsets = [0, 0], sizes = [1, 64], strides = [1, 1]} : vector<3x64xf32> to vector<1x64xf32>
    %50 = vector.broadcast %48 : vector<64x1xf32> to vector<64x64xf32>
    %51 = vector.broadcast %49 : vector<1x64xf32> to vector<64x64xf32>
    %52 = arith.mulf %50, %51 : vector<64x64xf32>
    %53 = vector.extract_strided_slice %47 {offsets = [0, 1], sizes = [64, 1], strides = [1, 1]} : vector<64x3xf32> to vector<64x1xf32>
    %54 = vector.extract_strided_slice %0 {offsets = [1, 0], sizes = [1, 64], strides = [1, 1]} : vector<3x64xf32> to vector<1x64xf32>
    %55 = vector.broadcast %53 : vector<64x1xf32> to vector<64x64xf32>
    %56 = vector.broadcast %54 : vector<1x64xf32> to vector<64x64xf32>
    %57 = arith.mulf %55, %56 : vector<64x64xf32>
    %58 = arith.addf %52, %57 : vector<64x64xf32>
    %59 = vector.extract_strided_slice %47 {offsets = [0, 2], sizes = [64, 1], strides = [1, 1]} : vector<64x3xf32> to vector<64x1xf32>
    %60 = vector.extract_strided_slice %0 {offsets = [2, 0], sizes = [1, 64], strides = [1, 1]} : vector<3x64xf32> to vector<1x64xf32>
    %61 = vector.broadcast %59 : vector<64x1xf32> to vector<64x64xf32>
    %62 = vector.broadcast %60 : vector<1x64xf32> to vector<64x64xf32>
    %63 = arith.mulf %61, %62 : vector<64x64xf32>
    %64 = arith.addf %58, %63 : vector<64x64xf32>
    %65 = vector.broadcast %1 : vector<1x64xf32> to vector<64x64xf32>
    %66 = arith.addf %64, %65 : vector<64x64xf32>
    %cst_26 = arith.constant 0.000000e+00 : f32
    %67 = vector.broadcast %cst_26 : f32 to vector<64x64xf32>
    %68 = arith.maximumf %66, %67 : vector<64x64xf32>
    %cst_27 = arith.constant dense<0.000000e+00> : vector<64x128xf32>
    %69 = tpu.matmul %68, %2, %cst_27 {dimension_numbers = #tpu.dot_dimension_numbers<[1], [0], [0], [1], [0, 0, 1, 1], [], []>} : vector<64x64xf32>, vector<64x128xf32>, vector<64x128xf32> -> vector<64x128xf32>
    %70 = vector.broadcast %3 : vector<1x128xf32> to vector<64x128xf32>
    %71 = arith.addf %69, %70 : vector<64x128xf32>
    %cst_28 = arith.constant 0.000000e+00 : f32
    %72 = vector.broadcast %cst_28 : f32 to vector<64x128xf32>
    %73 = arith.maximumf %71, %72 : vector<64x128xf32>
    %74 = vector.shape_cast %73 : vector<64x128xf32> to vector<2x32x128xf32>
    %cst_29 = arith.constant dense<0xFF800000> : vector<2x128xf32>
    %75 = vector.multi_reduction <maximumf>, %74, %cst_29 [1] : vector<2x32x128xf32> to vector<2x128xf32>
    %c0_30 = arith.constant 0 : index
    %c0_31 = arith.constant 0 : index
    %76 = vector.load %arg10[%c0_30, %c0_31] : memref<128x256xf32, #tpu.memory_space<vmem>>, vector<128x256xf32>
    %c0_32 = arith.constant 0 : index
    %c0_33 = arith.constant 0 : index
    %77 = vector.load %arg11[%c0_32, %c0_33] : memref<1x256xf32, #tpu.memory_space<vmem>>, vector<1x256xf32>
    %c0_34 = arith.constant 0 : index
    %c0_35 = arith.constant 0 : index
    %78 = vector.load %arg12[%c0_34, %c0_35] : memref<256x128xf32, #tpu.memory_space<vmem>>, vector<256x128xf32>
    %c0_36 = arith.constant 0 : index
    %c0_37 = arith.constant 0 : index
    %79 = vector.load %arg13[%c0_36, %c0_37] : memref<1x128xf32, #tpu.memory_space<vmem>>, vector<1x128xf32>
    %cst_38 = arith.constant dense<0.000000e+00> : vector<2x256xf32>
    %80 = tpu.matmul %75, %76, %cst_38 {dimension_numbers = #tpu.dot_dimension_numbers<[1], [0], [0], [1], [0, 0, 1, 1], [], []>} : vector<2x128xf32>, vector<128x256xf32>, vector<2x256xf32> -> vector<2x256xf32>
    %81 = vector.broadcast %77 : vector<1x256xf32> to vector<2x256xf32>
    %82 = arith.addf %80, %81 : vector<2x256xf32>
    %cst_39 = arith.constant 0.000000e+00 : f32
    %83 = vector.broadcast %cst_39 : f32 to vector<2x256xf32>
    %84 = arith.maximumf %82, %83 : vector<2x256xf32>
    %cst_40 = arith.constant dense<0.000000e+00> : vector<2x128xf32>
    %85 = tpu.matmul %84, %78, %cst_40 {dimension_numbers = #tpu.dot_dimension_numbers<[1], [0], [0], [1], [0, 0, 1, 1], [], []>} : vector<2x256xf32>, vector<256x128xf32>, vector<2x128xf32> -> vector<2x128xf32>
    %86 = vector.broadcast %79 : vector<1x128xf32> to vector<2x128xf32>
    %87 = arith.addf %85, %86 : vector<2x128xf32>
    %cst_41 = arith.constant 0.000000e+00 : f32
    %88 = vector.broadcast %cst_41 : f32 to vector<2x128xf32>
    %89 = arith.maximumf %87, %88 : vector<2x128xf32>
    %c0_42 = arith.constant 0 : index
    %c0_43 = arith.constant 0 : index
    %90 = vector.load %arg14[%c0_42, %c0_43] : memref<128x128xf32, #tpu.memory_space<vmem>>, vector<128x128xf32>
    %cst_44 = arith.constant dense<0.000000e+00> : vector<2x128xf32>
    %91 = tpu.matmul %46, %90, %cst_44 {dimension_numbers = #tpu.dot_dimension_numbers<[1], [0], [0], [1], [0, 0, 1, 1], [], []>} : vector<2x128xf32>, vector<128x128xf32>, vector<2x128xf32> -> vector<2x128xf32>
    %c0_45 = arith.constant 0 : index
    %c0_46 = arith.constant 0 : index
    %92 = vector.load %arg15[%c0_45, %c0_46] : memref<128x128xf32, #tpu.memory_space<vmem>>, vector<128x128xf32>
    %cst_47 = arith.constant dense<0.000000e+00> : vector<2x128xf32>
    %93 = tpu.matmul %89, %92, %cst_47 {dimension_numbers = #tpu.dot_dimension_numbers<[1], [0], [0], [1], [0, 0, 1, 1], [], []>} : vector<2x128xf32>, vector<128x128xf32>, vector<2x128xf32> -> vector<2x128xf32>
    %94 = arith.addf %91, %93 : vector<2x128xf32>
    %c0_48 = arith.constant 0 : index
    %c0_49 = arith.constant 0 : index
    %95 = vector.load %arg16[%c0_48, %c0_49] : memref<1x128xf32, #tpu.memory_space<vmem>>, vector<1x128xf32>
    %96 = vector.broadcast %95 : vector<1x128xf32> to vector<2x128xf32>
    %97 = arith.addf %94, %96 : vector<2x128xf32>
    %cst_50 = arith.constant 0.000000e+00 : f32
    %98 = vector.broadcast %cst_50 : f32 to vector<2x128xf32>
    %99 = arith.maximumf %97, %98 : vector<2x128xf32>
    %c0_51 = arith.constant 0 : index
    %c0_52 = arith.constant 0 : index
    %100 = vector.load %arg17[%c0_51, %c0_52] : memref<128x256xf32, #tpu.memory_space<vmem>>, vector<128x256xf32>
    %cst_53 = arith.constant dense<0.000000e+00> : vector<2x256xf32>
    %101 = tpu.matmul %99, %100, %cst_53 {dimension_numbers = #tpu.dot_dimension_numbers<[1], [0], [0], [1], [0, 0, 1, 1], [], []>} : vector<2x128xf32>, vector<128x256xf32>, vector<2x256xf32> -> vector<2x256xf32>
    %c0_54 = arith.constant 0 : index
    %c0_55 = arith.constant 0 : index
    %102 = vector.load %arg18[%c0_54, %c0_55] : memref<1x256xf32, #tpu.memory_space<vmem>>, vector<1x256xf32>
    %103 = vector.broadcast %102 : vector<1x256xf32> to vector<2x256xf32>
    %104 = arith.addf %101, %103 : vector<2x256xf32>
    %cst_56 = arith.constant 0.000000e+00 : f32
    %105 = vector.broadcast %cst_56 : f32 to vector<2x256xf32>
    %106 = arith.maximumf %104, %105 : vector<2x256xf32>
    %c0_57 = arith.constant 0 : index
    %c0_58 = arith.constant 0 : index
    %107 = vector.load %arg19[%c0_57, %c0_58] : memref<256x128xf32, #tpu.memory_space<vmem>>, vector<256x128xf32>
    %cst_59 = arith.constant dense<0.000000e+00> : vector<2x128xf32>
    %108 = tpu.matmul %106, %107, %cst_59 {dimension_numbers = #tpu.dot_dimension_numbers<[1], [0], [0], [1], [0, 0, 1, 1], [], []>} : vector<2x256xf32>, vector<256x128xf32>, vector<2x128xf32> -> vector<2x128xf32>
    %c0_60 = arith.constant 0 : index
    %c0_61 = arith.constant 0 : index
    %109 = vector.load %arg20[%c0_60, %c0_61] : memref<1x128xf32, #tpu.memory_space<vmem>>, vector<1x128xf32>
    %110 = vector.broadcast %109 : vector<1x128xf32> to vector<2x128xf32>
    %111 = arith.addf %108, %110 : vector<2x128xf32>
    %c0_62 = arith.constant 0 : index
    %c0_63 = arith.constant 0 : index
    %112 = vector.load %arg21[%c0_62, %c0_63] : memref<1x128xf32, #tpu.memory_space<vmem>>, vector<1x128xf32>
    %113 = vector.broadcast %112 : vector<1x128xf32> to vector<2x128xf32>
    %114 = arith.addf %111, %113 : vector<2x128xf32>
    %c0_64 = arith.constant 0 : index
    %c0_65 = arith.constant 0 : index
    %115 = vector.load %arg22[%c0_64, %c0_65] : memref<2x128xf32, #tpu.memory_space<vmem>>, vector<2x128xf32>
    tpu.vector_store %arg22[%c0_64, %c0_65], %114 {strides = array<i32>} : memref<2x128xf32, #tpu.memory_space<vmem>>, vector<2x128xf32>,
    return
  }
}

</mosaic_0001>

<bundles_post_ra>
// kernel: model_forward.1
= control target key start
LH: loop header
LB: loop body
LE: loop exit
PB: predicated region body
PF: predicated region fallthrough
CT: control target
= control target key end

     0   :  { %s3253_s0 = inlined_call_operand.vmem [shape: f32[128,3], index: 0, kind: input, shape index: {}]   ;;  %s3254_s1 = inlined_call_operand.vmem [shape: f32[64,3], index: 1, kind: input, shape index: {}]   ;;  %s3255_s2 = inlined_call_operand.vmem [shape: f32[3,64], index: 2, kind: input, shape index: {}]   ;;  %s3256_s3 = inlined_call_operand.vmem [shape: f32[1,64], index: 3, kind: input, shape index: {}]   ;;  %s3257_s4 = inlined_call_operand.vmem [shape: f32[64,128], index: 4, kind: input, shape index: {}]   ;;  %s3258_s5 = inlined_call_operand.vmem [shape: f32[1,128], index: 5, kind: input, shape index: {}]   ;;  %s3259_s6 = inlined_call_operand.hbm [shape: f32[128,256], index: 6, kind: input, shape index: {}]   ;;  %s3260_s7 = inlined_call_operand.vmem [shape: f32[1,256], index: 7, kind: input, shape index: {}]   ;;  %s3261_s8 = inlined_call_operand.hbm [shape: f32[256,128], index: 8, kind: input, shape index: {}]   ;;  %s3262_s9 = inlined_call_operand.vmem [shape: f32[1,128], index: 9, kind: input, shape index: {}]   ;;  %s3263_s10 = inlined_call_operand.hbm [shape: f32[128,256], index: 10, kind: input, shape index: {}]   ;;  %s3264_s11 = inlined_call_operand.vmem [shape: f32[1,256], index: 11, kind: input, shape index: {}]   ;;  %s3265_s12 = inlined_call_operand.hbm [shape: f32[256,128], index: 12, kind: input, shape index: {}]   ;;  %s3266_s13 = inlined_call_operand.vmem [shape: f32[1,128], index: 13, kind: input, shape index: {}]   ;;  %s3267_s14 = inlined_call_operand.vmem [shape: f32[128,128], index: 14, kind: input, shape index: {}]   ;;  %s3268_s15 = inlined_call_operand.hbm [shape: f32[128,128], index: 15, kind: input, shape index: {}]   ;;  %s3269_s16 = inlined_call_operand.vmem [shape: f32[1,128], index: 16, kind: input, shape index: {}]   ;;  %s3270_s17 = inlined_call_operand.hbm [shape: f32[128,256], index: 17, kind: input, shape index: {}]   ;;  %s3271_s18 = inlined_call_operand.vmem [shape: f32[1,256], index: 18, kind: input, shape index: {}]   ;;  %s3272_s19 = inlined_call_operand.hbm [shape: f32[256,128], index: 19, kind: input, shape index: {}]   ;;  %s3273_s20 = inlined_call_operand.vmem [shape: f32[1,128], index: 20, kind: input, shape index: {}]   ;;  %s3274_s21 = inlined_call_operand.vmem [shape: f32[1,128], index: 21, kind: input, shape index: {}]   ;;  %s3275_s22 = inlined_call_operand.vmem [shape: f32[2,128], index: 22, kind: output, shape index: {}]  }
   0x1   :  { %3279 = sst [smem:[#allocation17_spill]] %s3253_s0 }
   0x2   :  { %3280 = sst [smem:[#allocation18_spill]] %s3254_s1 }
   0x3   :  { %3281 = sst [smem:[#allocation19_spill]] %s3255_s2 }
   0x4   :  { %3282 = sst [smem:[#allocation20_spill]] %s3256_s3 }
   0x5   :  { %3283 = sst [smem:[#allocation21_spill]] %s3257_s4 }
   0x6   :  { %3284 = sst [smem:[#allocation22_spill]] %s3258_s5 }
   0x7   :  { %3285 = sst [smem:[#allocation23_spill]] %s3259_s6 }
   0x8   :  { %27 = vsyncpa [#allocation3], 0 }
   0x9   :  { %28 = vsyncpa [#allocation5], 0 }
   0xa   :  { %29 = vsyncpa [#allocation8], 0 }
   0xb   :  { %30 = vsyncpa [#allocation11], 0  ;;  %s2545_s3 = smov [#allocation4]  }
   0xc   :  { %s62_s28 = sshll.u32 %s2545_s3, 4  ;;  %s63_s28 = int_to_ptr.vmem [resolvable:$true] %s62_s28 }
   0xd   :  { %s2405_s29 = scalar_lea.vmem %s63_s28, 4096  ;;  %p2410_p1 = scmp.lt.s32.totalorder %s63_s28, %s63_s28 }
   0xe   :  { %p2406_p0 = scmp.ne.s32.totalorder %s63_s28, %s2405_s29  ;;  %p2411_p2 = scmp.lt.s32.totalorder %s2405_s29, %s2405_s29 }
  0x10   :  { %p2412_p3 = por %p2411_p2, %p2410_p1 }
  0x12   :  { %p2413_p4 = pnand %p2412_p3, %p2406_p0 }
  0x14   :  { %2416 = shalt.err (!%p2413_p4)
}
  0x15   :  { %s2546_s30 = smov 128   ;;  %s2547_s4 = smov 8  }
  0x16   :  { %68 = dma.hbm_to_vmem [thread:$0]  %s3261_s8, 4096, %s63_s28, [#allocation5], %s2546_s30, %s2546_s30, %s2547_s4  }
  0x17   :  { %s2548_s1 = smov [#allocation7]  }
  0x18   :  { %s90_s5 = sshll.u32 %s2548_s1, 4  ;;  %s91_s5 = int_to_ptr.vmem [resolvable:$true] %s90_s5 }
  0x19   :  { %s2425_s24 = scalar_lea.vmem %s91_s5, 4096  ;;  %p2430_p6 = scmp.lt.s32.totalorder %s91_s5, %s91_s5 }
  0x1a   :  { %p2426_p5 = scmp.ne.s32.totalorder %s91_s5, %s2425_s24  ;;  %p2431_p7 = scmp.lt.s32.totalorder %s2425_s24, %s2425_s24 }
  0x1c   :  { %p2432_p8 = por %p2431_p7, %p2430_p6 }
  0x1e   :  { %p2433_p9 = pnand %p2432_p8, %p2426_p5 }
  0x20   :  { %2436 = shalt.err (!%p2433_p9)
}
  0x21   :  { %96 = dma.hbm_to_vmem [thread:$0]  %s3265_s12, 4096, %s91_s5, [#allocation8], %s2546_s30, %s2546_s30, %s2547_s4  }
  0x22   :  { %s2549_s26 = smov [#allocation10]   ;;  %s2550_s8 = smov [#allocation2]  }
  0x23   :  { %s120_s2 = sshll.u32 %s2549_s26, 4  ;;  %s48_s27 = sshll.u32 %s2550_s8, 4  ;;  %s121_s2 = int_to_ptr.vmem [resolvable:$true] %s120_s2  ;;  %s49_s27 = int_to_ptr.vmem [resolvable:$true] %s48_s27 }
  0x24   :  { %s2445_s3 = scalar_lea.vmem %s121_s2, 4096  ;;  %p2450_p11 = scmp.lt.s32.totalorder %s121_s2, %s121_s2 }
  0x25   :  { %p2446_p10 = scmp.ne.s32.totalorder %s121_s2, %s2445_s3  ;;  %p2451_p12 = scmp.lt.s32.totalorder %s2445_s3, %s2445_s3 }
  0x27   :  { %p2452_p13 = por %p2451_p12, %p2450_p11 }
  0x29   :  { %p2453_p0 = pnand %p2452_p13, %p2446_p10 }
  0x2b   :  { %2456 = shalt.err (!%p2453_p0)
}
  0x2c   :  { %s2551_s28 = smov 256   ;;  %s2552_s29 = smov 16  }
  0x2d   :  { %126 = dma.hbm_to_vmem [thread:$0]  %s3270_s17, 4096, %s121_s2, [#allocation11], %s2551_s28, %s2551_s28, %s2552_s29  }
  0x2e   :  { %s2465_s12 = scalar_lea.vmem %s49_s27, 4096  ;;  %p2470_p2 = scmp.lt.s32.totalorder %s49_s27, %s49_s27 }
  0x2f   :  { %p2466_p1 = scmp.ne.s32.totalorder %s49_s27, %s2465_s12  ;;  %p2471_p3 = scmp.lt.s32.totalorder %s2465_s12, %s2465_s12 }
  0x31   :  { %p2472_p4 = por %p2471_p3, %p2470_p2 }
  0x33   :  { %p2473_p5 = pnand %p2472_p4, %p2466_p1 }
  0x35   :  { %2476 = shalt.err (!%p2473_p5)
}
  0x36   :  { %s3286_s24 = sld [smem:[#allocation23_spill]]  ;;  %s2553_s6 = smov [#allocation6]  }
  0x37   :  { %s76_s25 = sshll.u32 %s2553_s6, 4  ;;  %s2554_s26 = smov [#allocation9]   ;;  %s77_s25 = int_to_ptr.vmem [resolvable:$true] %s76_s25 }
  0x38   :  { %s106_s8 = sshll.u32 %s2554_s26, 4  ;;  %s2485_s3 = scalar_lea.vmem %s77_s25, 4096  ;;  %s107_s8 = int_to_ptr.vmem [resolvable:$true] %s106_s8 }
  0x39   :  { %p2486_p6 = scmp.ne.s32.totalorder %s77_s25, %s2485_s3  ;;  %p2490_p7 = scmp.lt.s32.totalorder %s77_s25, %s77_s25 }
  0x3a   :  { %p2491_p8 = scmp.lt.s32.totalorder %s2485_s3, %s2485_s3 }
  0x3c   :  { %54 = dma.hbm_to_vmem [thread:$0]  %s3286_s24, 4096, %s49_s27, [#allocation3], %s2551_s28, %s2551_s28, %s2552_s29  }
  0x3d   :  { %p2492_p9 = por %p2491_p8, %p2490_p7 }
  0x3f   :  { %p2493_p10 = pnand %p2492_p9, %p2486_p6 }
  0x41   :  { %2496 = shalt.err (!%p2493_p10)
}
  0x42   :  { %82 = dma.hbm_to_vmem [thread:$0]  %s3263_s10, 4096, %s77_s25, [#allocation5], %s2551_s28, %s2551_s28, %s2552_s29  }
  0x43   :  { %s2505_s0 = scalar_lea.vmem %s107_s8, 2048  ;;  %p2510_p12 = scmp.lt.s32.totalorder %s107_s8, %s107_s8 }
  0x44   :  { %p2506_p11 = scmp.ne.s32.totalorder %s107_s8, %s2505_s0  ;;  %p2511_p13 = scmp.lt.s32.totalorder %s2505_s0, %s2505_s0 }
  0x46   :  { %p2512_p0 = por %p2511_p13, %p2510_p12 }
  0x48   :  { %p2513_p1 = pnand %p2512_p0, %p2506_p11 }
  0x4a   :  { %2516 = shalt.err (!%p2513_p1)
}
  0x4b   :  { %112 = dma.hbm_to_vmem [thread:$0]  %s3268_s15, 2048, %s107_s8, [#allocation8], %s2546_s30, %s2546_s30, %s2547_s4  }
  0x4c   :  { %s2555_s12 = smov [#allocation12]  }
  0x4d   :  { %s134_s1 = sshll.u32 %s2555_s12, 4  ;;  %s135_s1 = int_to_ptr.vmem [resolvable:$true] %s134_s1 }
  0x4e   :  { %s2525_s5 = scalar_lea.vmem %s135_s1, 4096  ;;  %p2530_p3 = scmp.lt.s32.totalorder %s135_s1, %s135_s1 }
  0x4f   :  { %p2526_p2 = scmp.ne.s32.totalorder %s135_s1, %s2525_s5  ;;  %p2531_p4 = scmp.lt.s32.totalorder %s2525_s5, %s2525_s5 }
  0x51   :  { %p2532_p5 = por %p2531_p4, %p2530_p3 }
  0x53   :  { %p2533_p6 = pnand %p2532_p5, %p2526_p2 }
  0x55   :  { %2536 = shalt.err (!%p2533_p6)
}
  0x56   :  { %140 = dma.hbm_to_vmem [thread:$0]  %s3272_s19, 4096, %s135_s1, [#allocation11], %s2546_s30, %s2546_s30, %s2547_s4  }
  0x57   :  { %2537 = dma.done.wait [#allocation3], 4096  }
  0x58   :  { %2538 = vsyncadd [#allocation3], 4294963200 }
  0x59   :  { %2539 = dma.done.wait [#allocation5], 8192  }
  0x5a   :  { %2540 = vsyncadd [#allocation5], 4294959104 }
  0x5b   :  { %2541 = dma.done.wait [#allocation8], 6144  }
  0x5c   :  { %2542 = vsyncadd [#allocation8], 4294961152 }
  0x5d   :  { %2543 = dma.done.wait [#allocation11], 8192  }
  0x5e   :  { %2544 = vsyncadd [#allocation11], 4294959104  ;;  %v2556_v0 = vmov 0   ;;  %s3287_s24 = sld [smem:[#allocation17_spill]]  ;;  %v2557_v3 = vmov 1   ;;  %v2558_v5 = vmov 2   ;;  %v273_v26 = vlaneseq }
  0x5f   :  { %2349 = vset.pattern.permute.xlu1 %v2556_v0  ;;  %2347 = vset.pattern.permute.xlu0 %v2556_v0  ;;  %s3288_s10 = sld [smem:[#allocation21_spill]]  ;;  %vm537_vm0 = vcmask 523264   ;;  %vm852_vm1 = vcmask 1041409   ;;  %vm2560_vm2 = vmmov 0  }
  0x60   :  { %v274_v27 = vshrl.u32 %v273_v26, 7  ;;  %s3289_s17 = sld [smem:[#allocation19_spill]] }
  0x61   :  { %s3290_s23 = sld [smem:[#allocation20_spill]] }
  0x62   :  { %v2826_v28 = vsub.s32 0, %v274_v27  ;;  %v2832_v32 = vsub.s32 1, %v274_v27  ;;  %v459_v35 = vsub.s32 2, %v274_v27  ;;  %s3291_s5 = sld [smem:[#allocation18_spill]] }
  0x64   :  { %v178_v1 = vld [vmem:[%s3287_s24 + $0x8] sm:$0xff]  ;;  %v177_v2 = vld [vmem:[%s3287_s24] sm:$0xff]  ;;  %v180_v4 = vld [vmem:[%s3287_s24 + $0x18] sm:$0xff] }
  0x65   :  { %200 = vperm.xlu1 %2349, %v178_v1   ;;  %195 = vperm.xlu0 %2347, %v177_v2   ;;  %v182_v6 = vld [vmem:[%s3287_s24 + $0x28] sm:$0xff]  ;;  %v179_v7 = vld [vmem:[%s3287_s24 + $0x10] sm:$0xff]  ;;  %v184_v8 = vld [vmem:[%s3287_s24 + $0x38] sm:$0xff] }
  0x66   :  { %v2738_v9 = vld [vmem:[%s3287_s24 + $0x48] sm:$0xff]  ;;  %v2744_v10 = vld [vmem:[%s3287_s24 + $0x58] sm:$0xff]  ;;  %v174_v13 = vld [vmem:[%s3288_s10 + $0x30] sm:$0xff] }
  0x67   :  { %v2750_v11 = vld [vmem:[%s3288_s10 + $0x38] sm:$0xff]  ;;  %v2755_v12 = vld [vmem:[%s3287_s24 + $0x68] sm:$0xff]  ;;  %v181_v15 = vld [vmem:[%s3287_s24 + $0x20] sm:$0xff] }
  0x68   :  { %2193 = vmatprep.subr.mxu0 %v2750_v11  ;;  %v173_v14 = vld [vmem:[%s3288_s10 + $0x28] sm:$0xff]  ;;  %v2773_v16 = vld [vmem:[%s3287_s24 + $0x78] sm:$0xff]  ;;  %v172_v17 = vld [vmem:[%s3288_s10 + $0x20] sm:$0xff] }
  0x69   :  { %2350 = vset.pattern.permute.xlu1 %v2557_v3  ;;  %2348 = vset.pattern.permute.xlu0 %v2557_v3  ;;  %v171_v18 = vld [vmem:[%s3288_s10 + $0x18] sm:$0xff]  ;;  %v170_v19 = vld [vmem:[%s3288_s10 + $0x10] sm:$0xff]  ;;  %v169_v20 = vld [vmem:[%s3288_s10 + $0x8] sm:$0xff] }
  0x6a   :  { %298 = vperm.xlu1 %2350, %v178_v1   ;;  %294 = vperm.xlu0 %2348, %v177_v2   ;;  %v168_v21 = vld [vmem:[%s3288_s10] sm:$0xff]  ;;  %v183_v22 = vld [vmem:[%s3287_s24 + $0x30] sm:$0xff]  ;;  %v1006_v57 = vld [vmem:[%s3291_s5 + $0x8] sm:$0xff] }
  0x6b   :  { %2194 = vmatpush3.msra.mxu0 %v2750_v11  ;;  %v185_v23 = vld [vmem:[%s3287_s24 + $0x40] sm:$0xff]  ;;  %v187_v24 = vld [vmem:[%s3287_s24 + $0x50] sm:$0xff]  ;;  %v2875_v59 = vld [vmem:[%s3291_s5 + $0x18] sm:$0xff] }
  0x6c   :  { %2195 = vmatprep.subr.mxu0 %v174_v13  ;;  %v189_v25 = vld [vmem:[%s3287_s24 + $0x60] sm:$0xff]  ;;  %v191_v34 = vld [vmem:[%s3287_s24 + $0x70] sm:$0xff]  ;;  %v2884_v62 = vld [vmem:[%s3291_s5 + $0x28] sm:$0xff] }
  0x6d   :  { %2196 = vmatpush3.msra.mxu0 %v174_v13  ;;  %v166_v30 = vld [vmem:[%s3289_s17] sm:$0x7] }
  0x6e   :  { %2351 = vset.pattern.permute.xlu1 %v2558_v5  ;;  %2354 = vset.pattern.permute.xlu0 %v2556_v0  ;;  %v2835_v33 = vrot.slane %v166_v30, %v2826_v28  ;;  %v2841_v36 = vrot.slane %v166_v30, %v2832_v32  ;;  %v2846_v41 = vrot.slane %v166_v30, %v459_v35  ;;  %v2853_v46 = vld [vmem:[%s3290_s23] ss:$0 sm:$0xff]  ;;  %s3292_s23 = sld [smem:[#allocation22_spill]] }
  0x6f   :  { %394 = vperm.xlu1 %2351, %v177_v2   ;;  %210 = vperm.xlu0 %2354, %v180_v4   ;;  %v1005_v56 = vld [vmem:[%s3291_s5] sm:$0xff] }
  0x70   :  { %2197 = vmatprep.subr.mxu0 %v173_v14 }
  0x71   :  { %2198 = vmatpush3.msra.mxu0 %v173_v14 }
  0x72   :  { %2199 = vmatprep.subr.mxu0 %v172_v17 }
  0x73   :  { %2352 = vset.pattern.permute.xlu1 %v2556_v0  ;;  %220 = vperm.xlu0 %2354, %v182_v6  }
  0x74   :  { %205 = vperm.xlu1 %2352, %v179_v7   ;;  %2200 = vmatpush3.msra.mxu0 %v172_v17 }
  0x75   :  { %2201 = vmatprep.subr.mxu0 %v171_v18 }
  0x76   :  { %2202 = vmatpush3.msra.mxu0 %v171_v18 }
  0x77   :  { %230 = vperm.xlu0 %2354, %v184_v8   ;;  %2203 = vmatprep.subr.mxu0 %v170_v19 }
  0x78   :  { %2353 = vset.pattern.permute.xlu1 %v2557_v3  ;;  %2204 = vmatpush3.msra.mxu0 %v170_v19 }
  0x79   :  { %302 = vperm.xlu1 %2353, %v179_v7   ;;  %2205 = vmatprep.subr.mxu0 %v169_v20 }
  0x7a   :  { %2206 = vmatpush3.msra.mxu0 %v169_v20  ;;  %v1007_v20 = vld [vmem:[%s3291_s5 + $0x10] sm:$0xff] }
  0x7b   :  { %240 = vperm.xlu0 %2354, %v2738_v9   ;;  %2207 = vmatprep.subr.mxu0 %v168_v21 }
  0x7c   :  { %2208 = vmatpush3.msra.mxu0 %v168_v21 }
  0x7d   :  { %306 = vperm.xlu1 %2353, %v180_v4  }
  0x7f   :  { %250 = vperm.xlu0 %2354, %v2744_v10  }
  0x81   :  { %2355 = vset.pattern.permute.xlu1 %v2558_v5 }
  0x82   :  { %402 = vperm.xlu1 %2355, %v179_v7   ;;  %v2895_v7 = vld [vmem:[%s3291_s5 + $0x38] sm:$0xff] }
  0x83   :  { %260 = vperm.xlu0 %2354, %v2755_v12  }
  0x86   :  { %2356 = vset.pattern.permute.xlu1 %v2556_v0 }
  0x87   :  { %215 = vperm.xlu1 %2356, %v181_v15   ;;  %270 = vperm.xlu0 %2354, %v2773_v16  }
  0x8b   :  { %2357 = vset.pattern.permute.xlu1 %v2557_v3  ;;  %2373 = vset.pattern.permute.xlu0 %v2558_v5 }
  0x8c   :  { %310 = vperm.xlu1 %2357, %v181_v15   ;;  %398 = vperm.xlu0 %2373, %v178_v1  }
  0x90   :  { %314 = vperm.xlu1 %2357, %v182_v6   ;;  %406 = vperm.xlu0 %2373, %v180_v4  }
  0x94   :  { %2358 = vset.pattern.permute.xlu1 %v2558_v5  ;;  %414 = vperm.xlu0 %2373, %v182_v6  }
  0x95   :  { %410 = vperm.xlu1 %2358, %v181_v15  }
  0x98   :  { %422 = vperm.xlu0 %2373, %v184_v8  }
  0x99   :  { %2359 = vset.pattern.permute.xlu1 %v2556_v0 }
  0x9a   :  { %225 = vperm.xlu1 %2359, %v183_v22  }
  0x9c   :  { %430 = vperm.xlu0 %2373, %v2738_v9  }
  0x9e   :  { %2360 = vset.pattern.permute.xlu1 %v2557_v3 }
  0x9f   :  { %318 = vperm.xlu1 %2360, %v183_v22  }
  0xa0   :  { %438 = vperm.xlu0 %2373, %v2744_v10  }
  0xa3   :  { %322 = vperm.xlu1 %2360, %v184_v8  }
  0xa4   :  { %446 = vperm.xlu0 %2373, %v2755_v12  }
  0xa7   :  { %2361 = vset.pattern.permute.xlu1 %v2558_v5 }
  0xa8   :  { %418 = vperm.xlu1 %2361, %v183_v22   ;;  %454 = vperm.xlu0 %2373, %v2773_v16  }
  0xac   :  { %2362 = vset.pattern.permute.xlu1 %v2556_v0  ;;  %2377 = vset.pattern.permute.xlu0 %v2556_v0 }
  0xad   :  { %235 = vperm.xlu1 %2362, %v185_v23   ;;  %1020 = vperm.xlu0 %2377, %v1006_v57  }
  0xb1   :  { %2363 = vset.pattern.permute.xlu1 %v2557_v3  ;;  %1030 = vperm.xlu0 %2377, %v2875_v59  }
  0xb2   :  { %326 = vperm.xlu1 %2363, %v185_v23  }
  0xb5   :  { %1040 = vperm.xlu0 %2377, %v2884_v62  }
  0xb6   :  { %330 = vperm.xlu1 %2363, %v2738_v9  }
  0xb9   :  { %1050 = vperm.xlu0 %2377, %v2895_v7  }
  0xba   :  { %2364 = vset.pattern.permute.xlu1 %v2558_v5 }
  0xbb   :  { %426 = vperm.xlu1 %2364, %v185_v23  }
  0xbd   :  { %2387 = vset.pattern.permute.xlu0 %v2558_v5 }
  0xbe   :  { %1114 = vperm.xlu0 %2387, %v1006_v57  }
  0xbf   :  { %2365 = vset.pattern.permute.xlu1 %v2556_v0 }
  0xc0   :  { %245 = vperm.xlu1 %2365, %v187_v24  }
  0xc2   :  { %1122 = vperm.xlu0 %2387, %v2875_v59  }
  0xc4   :  { %2366 = vset.pattern.permute.xlu1 %v2557_v3 }
  0xc5   :  { %334 = vperm.xlu1 %2366, %v187_v24  }
  0xc6   :  { %1130 = vperm.xlu0 %2387, %v2884_v62  }
  0xc9   :  { %338 = vperm.xlu1 %2366, %v2744_v10  }
  0xca   :  { %1138 = vperm.xlu0 %2387, %v2895_v7  }
  0xcd   :  { %2367 = vset.pattern.permute.xlu1 %v2558_v5 }
  0xce   :  { %434 = vperm.xlu1 %2367, %v187_v24  }
  0xd2   :  { %2368 = vset.pattern.permute.xlu1 %v2556_v0 }
  0xd3   :  { %255 = vperm.xlu1 %2368, %v189_v25  }
  0xd7   :  { %2369 = vset.pattern.permute.xlu1 %v2557_v3 }
  0xd8   :  { %342 = vperm.xlu1 %2369, %v189_v25  }
  0xdc   :  { %346 = vperm.xlu1 %2369, %v2755_v12  }
  0xe0   :  { %v201_v29 = vpop.permute.xlu1 %200  ;;  %2370 = vset.pattern.permute.xlu1 %v2558_v5  ;;  %v196_v31 = vpop.permute.xlu0 %195 }
  0xe1   :  { %442 = vperm.xlu1 %2370, %v189_v25   ;;  %v277_v37 = vmul.f32 %v2835_v33, %v196_v31  ;;  %v278_v10 = vmul.f32 %v2835_v33, %v201_v29 }
  0xe5   :  { %v299_v38 = vpop.permute.xlu1 %298  ;;  %2371 = vset.pattern.permute.xlu1 %v2556_v0  ;;  %v295_v39 = vpop.permute.xlu0 %294 }
  0xe6   :  { %265 = vperm.xlu1 %2371, %v191_v34   ;;  %v361_v40 = vmul.f32 %v2841_v36, %v295_v39  ;;  %v362_v8 = vmul.f32 %v2841_v36, %v299_v38 }
  0xe8   :  { %v377_v42 = vadd.f32 %v361_v40, %v277_v37  ;;  %v378_v15 = vadd.f32 %v362_v8, %v278_v10 }
  0xea   :  { %2372 = vset.pattern.permute.xlu1 %v2557_v3  ;;  %v395_v43 = vpop.permute.xlu1 %394  ;;  %v211_v44 = vpop.permute.xlu0 %210 }
  0xeb   :  { %v461_v45 = vmul.f32 %v2846_v41, %v395_v43  ;;  %350 = vperm.xlu1 %2372, %v191_v34  }
  0xed   :  { %v477_v47 = vadd.f32 %v461_v45, %v377_v42 }
  0xee   :  { %v221_v48 = vpop.permute.xlu0 %220 }
  0xef   :  { %354 = vperm.xlu1 %2372, %v2773_v16   ;;  %v206_v49 = vpop.permute.xlu1 %205  ;;  %v499_v50 = vadd.f32 %v2853_v46, %v477_v47  ;;  %v280_v16 = vmul.f32 %v2835_v33, %v211_v44  ;;  %v282_v21 = vmul.f32 %v2835_v33, %v221_v48 }
  0xf0   :  { %v279_v4 = vmul.f32 %v2835_v33, %v206_v49 }
  0xf1   :  { %v515_v51 = vmax.f32 %v499_v50, 0.0 }
  0xf2   :  { %v2857_v52 = vpop.permute.xlu0 %230 }
  0xf3   :  { %2374 = vset.pattern.permute.xlu1 %v2558_v5  ;;  %2209 = vmatprep.mubr.msk.f32.mxu0 %vm537_vm0, %v515_v51 }
  0xf4   :  { %450 = vperm.xlu1 %2374, %v191_v34   ;;  %v303_v53 = vpop.permute.xlu1 %302 }
  0xf5   :  { %v363_v63 = vmul.f32 %v2841_v36, %v303_v53 }
  0xf6   :  { %v2861_v54 = vpop.permute.xlu0 %240 }
  0xf7   :  { %v379_v9 = vadd.f32 %v363_v63, %v279_v4  ;;  %v284_v63 = vmul.f32 %v2835_v33, %v2857_v52 }
  0xf8   :  { %v307_v55 = vpop.permute.xlu1 %306  ;;  %2375 = vset.pattern.permute.xlu1 %v2556_v0 }
  0xf9   :  { %1015 = vperm.xlu1 %2375, %v1005_v56   ;;  %v364_v17 = vmul.f32 %v2841_v36, %v307_v55 }
  0xfa   :  { %v2870_v58 = vpop.permute.xlu0 %250 }
  0xfb   :  { %v380_v25 = vadd.f32 %v364_v17, %v280_v16 }
  0xfd   :  { %v403_v60 = vpop.permute.xlu1 %402  ;;  %2376 = vset.pattern.permute.xlu1 %v2557_v3 }
  0xfe   :  { %v2877_v61 = vpop.permute.xlu0 %260  ;;  %1062 = vperm.xlu1 %2376, %v1005_v56   ;;  %v463_v6 = vmul.f32 %v2846_v41, %v403_v60 }
 0x100   :  { %v479_v12 = vadd.f32 %v463_v6, %v379_v9 }
 0x102   :  { %v216_v1 = vpop.permute.xlu1 %215  ;;  %v2887_v2 = vpop.permute.xlu0 %270  ;;  %1066 = vperm.xlu1 %2376, %v1006_v57   ;;  %v501_v22 = vadd.f32 %v2853_v46, %v479_v12 }
 0x103   :  { %v281_v37 = vmul.f32 %v2835_v33, %v216_v1 }
 0x104   :  { %v517_v35 = vmax.f32 %v501_v22, 0.0 }
 0x106   :  { %2378 = vset.pattern.permute.xlu1 %v2558_v5 }
 0x107   :  { %v311_v13 = vpop.permute.xlu1 %310  ;;  %v399_v14 = vpop.permute.xlu0 %398  ;;  %1110 = vperm.xlu1 %2378, %v1005_v56  }
 0x108   :  { %v462_v18 = vmul.f32 %v2846_v41, %v399_v14  ;;  %v365_v30 = vmul.f32 %v2841_v36, %v311_v13 }
 0x10a   :  { %v478_v19 = vadd.f32 %v462_v18, %v378_v15  ;;  %v381_v44 = vadd.f32 %v365_v30, %v281_v37 }
 0x10b   :  { %v315_v23 = vpop.permute.xlu1 %314  ;;  %v407_v24 = vpop.permute.xlu0 %406  ;;  %2379 = vset.pattern.permute.xlu1 %v2556_v0 }
 0x10c   :  { %v500_v26 = vadd.f32 %v2853_v46, %v478_v19  ;;  %v366_v27 = vmul.f32 %v2841_v36, %v315_v23  ;;  %v464_v29 = vmul.f32 %v2846_v41, %v407_v24  ;;  %1025 = vperm.xlu1 %2379, %v1007_v20   ;;  %v286_v23 = vmul.f32 %v2835_v33, %v2861_v54  ;;  %v1011_v24 = vld [vmem:[%s3291_s5 + $0x30] sm:$0xff] }
 0x10e   :  { %v516_v31 = vmax.f32 %v500_v26, 0.0  ;;  %v480_v34 = vadd.f32 %v464_v29, %v380_v25  ;;  %v382_v39 = vadd.f32 %v366_v27, %v282_v21 }
 0x10f   :  { %v415_v38 = vpop.permute.xlu0 %414 }
 0x110   :  { %v502_v40 = vadd.f32 %v2853_v46, %v480_v34  ;;  %v466_v42 = vmul.f32 %v2846_v41, %v415_v38  ;;  %v411_v43 = vpop.permute.xlu1 %410  ;;  %2210 = vmatmul.mubr.msk.f32.vlgmr.msra.gmra.mxu0 %vm537_vm0, %v516_v31  ;;  %2380 = vset.pattern.permute.xlu1 %v2557_v3 }
 0x111   :  { %v465_v45 = vmul.f32 %v2846_v41, %v411_v43  ;;  %2212 = vmatprep.mubr.msk.f32.mxu0 %vm537_vm0, %v517_v35  ;;  %1070 = vperm.xlu1 %2380, %v1007_v20  }
 0x112   :  { %v518_v47 = vmax.f32 %v502_v40, 0.0  ;;  %v482_v48 = vadd.f32 %v466_v42, %v382_v39 }
 0x113   :  { %v481_v49 = vadd.f32 %v465_v45, %v381_v44  ;;  %v423_v60 = vpop.permute.xlu0 %422  ;;  %v288_v45 = vmul.f32 %v2835_v33, %v2870_v58 }
 0x114   :  { %v504_v50 = vadd.f32 %v2853_v46, %v482_v48  ;;  %2213 = vmatmul.mubr.msk.f32.gmra.mxu0 %vm537_vm0, %v518_v47  ;;  %v468_v6 = vmul.f32 %v2846_v41, %v423_v60 }
 0x115   :  { %v503_v51 = vadd.f32 %v2853_v46, %v481_v49  ;;  %v226_v53 = vpop.permute.xlu1 %225  ;;  %1074 = vperm.xlu1 %2380, %v2875_v59   ;;  %v1009_v59 = vld [vmem:[%s3291_s5 + $0x20] sm:$0xff] }
 0x116   :  { %v520_v56 = vmax.f32 %v504_v50, 0.0  ;;  %v283_v10 = vmul.f32 %v2835_v33, %v226_v53 }
 0x117   :  { %v519_v55 = vmax.f32 %v503_v51, 0.0  ;;  %v431_v22 = vpop.permute.xlu0 %430 }
 0x118   :  { %v470_v26 = vmul.f32 %v2846_v41, %v431_v22 }
 0x119   :  { %2215 = vmatprep.mubr.msk.f32.mxu0 %vm537_vm0, %v519_v55  ;;  %2381 = vset.pattern.permute.xlu1 %v2558_v5 }
 0x11a   :  { %v319_v57 = vpop.permute.xlu1 %318  ;;  %2216 = vmatmul.mubr.msk.f32.gmra.mxu0 %vm537_vm0, %v520_v56  ;;  %1118 = vperm.xlu1 %2381, %v1007_v20  }
 0x11b   :  { %v367_v8 = vmul.f32 %v2841_v36, %v319_v57 }
 0x11d   :  { %v383_v52 = vadd.f32 %v367_v8, %v283_v10 }
 0x11e   :  { %v323_v1 = vpop.permute.xlu1 %322  ;;  %2382 = vset.pattern.permute.xlu1 %v2556_v0 }
 0x11f   :  { %v368_v4 = vmul.f32 %v2841_v36, %v323_v1  ;;  %1035 = vperm.xlu1 %2382, %v1009_v59  }
 0x121   :  { %v384_v9 = vadd.f32 %v368_v4, %v284_v63 }
 0x123   :  { %v484_v12 = vadd.f32 %v468_v6, %v384_v9  ;;  %v419_v13 = vpop.permute.xlu1 %418  ;;  %2383 = vset.pattern.permute.xlu1 %v2557_v3  ;;  %v290_v6 = vmul.f32 %v2835_v33, %v2877_v61 }
 0x124   :  { %v467_v14 = vmul.f32 %v2846_v41, %v419_v13  ;;  %1078 = vperm.xlu1 %2383, %v1009_v59  }
 0x125   :  { %v506_v16 = vadd.f32 %v2853_v46, %v484_v12 }
 0x126   :  { %v483_v15 = vadd.f32 %v467_v14, %v383_v52 }
 0x127   :  { %v522_v20 = vmax.f32 %v506_v16, 0.0 }
 0x128   :  { %v505_v17 = vadd.f32 %v2853_v46, %v483_v15  ;;  %v236_v18 = vpop.permute.xlu1 %235  ;;  %1082 = vperm.xlu1 %2383, %v2884_v62  }
 0x129   :  { %v285_v30 = vmul.f32 %v2835_v33, %v236_v18 }
 0x12a   :  { %v521_v19 = vmax.f32 %v505_v17, 0.0 }
 0x12c   :  { %2218 = vmatprep.mubr.msk.f32.mxu0 %vm537_vm0, %v521_v19  ;;  %2384 = vset.pattern.permute.xlu1 %v2558_v5 }
 0x12d   :  { %v327_v21 = vpop.permute.xlu1 %326  ;;  %2219 = vmatmul.mubr.msk.f32.gmra.mxu0 %vm537_vm0, %v522_v20  ;;  %1126 = vperm.xlu1 %2384, %v1009_v59  }
 0x12e   :  { %v369_v27 = vmul.f32 %v2841_v36, %v327_v21 }
 0x130   :  { %v385_v54 = vadd.f32 %v369_v27, %v285_v30 }
 0x131   :  { %v331_v25 = vpop.permute.xlu1 %330  ;;  %2385 = vset.pattern.permute.xlu1 %v2556_v0 }
 0x132   :  { %v370_v62 = vmul.f32 %v2841_v36, %v331_v25  ;;  %1045 = vperm.xlu1 %2385, %v1011_v24  }
 0x134   :  { %v386_v29 = vadd.f32 %v370_v62, %v286_v23  ;;  %v292_v62 = vmul.f32 %v2835_v33, %v2887_v2 }
 0x136   :  { %v486_v31 = vadd.f32 %v470_v26, %v386_v29  ;;  %v427_v34 = vpop.permute.xlu1 %426  ;;  %2386 = vset.pattern.permute.xlu1 %v2557_v3  ;;  %v439_v3 = vpop.permute.xlu0 %438 }
 0x137   :  { %v469_v35 = vmul.f32 %v2846_v41, %v427_v34  ;;  %1086 = vperm.xlu1 %2386, %v1011_v24   ;;  %v472_v48 = vmul.f32 %v2846_v41, %v439_v3  ;;  %v802_v3 = vld [vmem:[#allocation2 + $0xe8] sm:$0xff] }
 0x138   :  { %v508_v38 = vadd.f32 %v2853_v46, %v486_v31 }
 0x139   :  { %v485_v37 = vadd.f32 %v469_v35, %v385_v54 }
 0x13a   :  { %v524_v42 = vmax.f32 %v508_v38, 0.0  ;;  %v447_v9 = vpop.permute.xlu0 %446 }
 0x13b   :  { %v507_v39 = vadd.f32 %v2853_v46, %v485_v37  ;;  %v246_v0 = vpop.permute.xlu1 %245  ;;  %1090 = vperm.xlu1 %2386, %v2895_v7   ;;  %v474_v12 = vmul.f32 %v2846_v41, %v447_v9  ;;  %v780_v9 = vld [vmem:[#allocation2 + $0x38] sm:$0xff] }
 0x13c   :  { %v287_v50 = vmul.f32 %v2835_v33, %v246_v0 }
 0x13d   :  { %v523_v40 = vmax.f32 %v507_v39, 0.0 }
 0x13f   :  { %2221 = vmatprep.mubr.msk.f32.mxu0 %vm537_vm0, %v523_v40  ;;  %2388 = vset.pattern.permute.xlu1 %v2558_v5 }
 0x140   :  { %v335_v43 = vpop.permute.xlu1 %334  ;;  %2222 = vmatmul.mubr.msk.f32.gmra.mxu0 %vm537_vm0, %v524_v42  ;;  %1134 = vperm.xlu1 %2388, %v1011_v24   ;;  %v455_v24 = vpop.permute.xlu0 %454  ;;  %v804_v42 = vld [vmem:[#allocation2 + $0xf8] sm:$0xff] }
 0x141   :  { %v371_v7 = vmul.f32 %v2841_v36, %v335_v43  ;;  %v476_v29 = vmul.f32 %v2846_v41, %v455_v24  ;;  %v803_v43 = vld [vmem:[#allocation2 + $0xf0] sm:$0xff]  ;;  %855 = vmatprep.subr.mxu1 %v804_v42  ;;  %v818_v24 = vld [vmem:[#allocation4 + $0x60] sm:$0xff] }
 0x142   :  { %856 = vmatpush1.msra.mxu1 %v803_v43 }
 0x143   :  { %v387_v55 = vadd.f32 %v371_v7, %v287_v50  ;;  %857 = vmatprep.subr.mxu1 %v802_v3  ;;  %v797_v7 = vld [vmem:[#allocation2 + $0xc0] sm:$0xff]  ;;  %v795_v50 = vld [vmem:[#allocation2 + $0xb0] sm:$0xff] }
 0x144   :  { %v339_v44 = vpop.permute.xlu1 %338 }
 0x145   :  { %v372_v47 = vmul.f32 %v2841_v36, %v339_v44  ;;  %v801_v44 = vld [vmem:[#allocation2 + $0xe0] sm:$0xff] }
 0x146   :  { %858 = vmatpush1.msra.mxu1 %v801_v44 }
 0x147   :  { %v388_v49 = vadd.f32 %v372_v47, %v288_v45  ;;  %v800_v45 = vld [vmem:[#allocation2 + $0xd8] sm:$0xff]  ;;  %v799_v47 = vld [vmem:[#allocation2 + $0xd0] sm:$0xff] }
 0x148   :  { %859 = vmatprep.subr.mxu1 %v800_v45 }
 0x149   :  { %v488_v51 = vadd.f32 %v472_v48, %v388_v49  ;;  %v435_v53 = vpop.permute.xlu1 %434  ;;  %v798_v48 = vld [vmem:[#allocation2 + $0xc8] sm:$0xff]  ;;  %860 = vmatpush1.msra.mxu1 %v799_v47  ;;  %v796_v49 = vld [vmem:[#allocation2 + $0xb8] sm:$0xff] }
 0x14a   :  { %v471_v5 = vmul.f32 %v2846_v41, %v435_v53  ;;  %861 = vmatprep.subr.mxu1 %v798_v48  ;;  %v793_v53 = vld [vmem:[#allocation2 + $0xa0] sm:$0xff] }
 0x14b   :  { %v510_v57 = vadd.f32 %v2853_v46, %v488_v51  ;;  %862 = vmatpush1.msra.mxu1 %v797_v7  ;;  %v794_v51 = vld [vmem:[#allocation2 + $0xa8] sm:$0xff] }
 0x14c   :  { %v487_v56 = vadd.f32 %v471_v5, %v387_v55  ;;  %863 = vmatprep.subr.mxu1 %v796_v49  ;;  %v792_v55 = vld [vmem:[#allocation2 + $0x98] sm:$0xff]  ;;  %v791_v5 = vld [vmem:[#allocation2 + $0x90] sm:$0xff] }
 0x14d   :  { %v526_v59 = vmax.f32 %v510_v57, 0.0  ;;  %864 = vmatpush1.msra.mxu1 %v795_v50  ;;  %v789_v57 = vld [vmem:[#allocation2 + $0x80] sm:$0xff] }
 0x14e   :  { %v509_v60 = vadd.f32 %v2853_v46, %v487_v56  ;;  %v256_v58 = vpop.permute.xlu1 %255  ;;  %865 = vmatprep.subr.mxu1 %v794_v51  ;;  %v790_v56 = vld [vmem:[#allocation2 + $0x88] sm:$0xff] }
 0x14f   :  { %v289_v52 = vmul.f32 %v2835_v33, %v256_v58  ;;  %866 = vmatpush1.msra.mxu1 %v793_v53  ;;  %v787_v58 = vld [vmem:[#allocation2 + $0x70] sm:$0xff] }
 0x150   :  { %v525_v63 = vmax.f32 %v509_v60, 0.0  ;;  %867 = vmatprep.subr.mxu1 %v792_v55  ;;  %v788_v60 = vld [vmem:[#allocation2 + $0x78] sm:$0xff] }
 0x151   :  { %868 = vmatpush1.msra.mxu1 %v791_v5 }
 0x152   :  { %2224 = vmatprep.mubr.msk.f32.mxu0 %vm537_vm0, %v525_v63  ;;  %869 = vmatprep.subr.mxu1 %v790_v56  ;;  %v786_v63 = vld [vmem:[#allocation2 + $0x68] sm:$0xff]  ;;  %v3018_v56 = vld [vmem:[%s3292_s23] ss:$0 sm:$0xff] }
 0x153   :  { %v343_v1 = vpop.permute.xlu1 %342  ;;  %2225 = vmatmul.mubr.msk.f32.gmra.mxu0 %vm537_vm0, %v526_v59  ;;  %870 = vmatpush1.msra.mxu1 %v789_v57  ;;  %v785_v59 = vld [vmem:[#allocation2 + $0x60] sm:$0xff] }
 0x154   :  { %v373_v10 = vmul.f32 %v2841_v36, %v343_v1  ;;  %871 = vmatprep.subr.mxu1 %v788_v60  ;;  %v784_v1 = vld [vmem:[#allocation2 + $0x58] sm:$0xff] }
 0x155   :  { %872 = vmatpush1.msra.mxu1 %v787_v58 }
 0x156   :  { %v389_v16 = vadd.f32 %v373_v10, %v289_v52  ;;  %873 = vmatprep.subr.mxu1 %v786_v63  ;;  %v779_v10 = vld [vmem:[#allocation2 + $0x30] sm:$0xff]  ;;  %v776_v52 = vld [vmem:[#allocation2 + $0x18] sm:$0xff] }
 0x157   :  { %v347_v4 = vpop.permute.xlu1 %346  ;;  %874 = vmatpush1.msra.mxu1 %v785_v59 }
 0x158   :  { %v374_v8 = vmul.f32 %v2841_v36, %v347_v4  ;;  %875 = vmatprep.subr.mxu1 %v784_v1  ;;  %v783_v4 = vld [vmem:[#allocation2 + $0x50] sm:$0xff] }
 0x159   :  { %876 = vmatpush1.msra.mxu1 %v783_v4 }
 0x15a   :  { %v390_v13 = vadd.f32 %v374_v8, %v290_v6  ;;  %v782_v6 = vld [vmem:[#allocation2 + $0x48] sm:$0xff]  ;;  %v781_v8 = vld [vmem:[#allocation2 + $0x40] sm:$0xff] }
 0x15b   :  { %877 = vmatprep.subr.mxu1 %v782_v6 }
 0x15c   :  { %v490_v14 = vadd.f32 %v474_v12, %v390_v13  ;;  %v443_v15 = vpop.permute.xlu1 %442  ;;  %878 = vmatpush1.msra.mxu1 %v781_v8  ;;  %v778_v12 = vld [vmem:[#allocation2 + $0x28] sm:$0xff]  ;;  %v777_v13 = vld [vmem:[#allocation2 + $0x20] sm:$0xff] }
 0x15d   :  { %v473_v17 = vmul.f32 %v2846_v41, %v443_v15  ;;  %879 = vmatprep.subr.mxu1 %v780_v9  ;;  %v775_v15 = vld [vmem:[#allocation2 + $0x10] sm:$0xff] }
 0x15e   :  { %v512_v19 = vadd.f32 %v2853_v46, %v490_v14  ;;  %880 = vmatpush1.msra.mxu1 %v779_v10  ;;  %v2559_v14 = vmov 0.0  }
 0x15f   :  { %v489_v18 = vadd.f32 %v473_v17, %v389_v16  ;;  %919 = vmatprep.mubr.f32.mxu1 %v2559_v14  ;;  %881 = vmatprep.subr.mxu1 %v778_v12  ;;  %v774_v16 = vld [vmem:[#allocation2 + $0x8] sm:$0xff]  ;;  %v773_v17 = vld [vmem:[#allocation2] sm:$0xff] }
 0x160   :  { %v528_v22 = vmax.f32 %v512_v19, 0.0  ;;  %882 = vmatpush1.msra.mxu1 %v777_v13  ;;  %v821_v19 = vld [vmem:[#allocation4 + $0x78] sm:$0xff] }
 0x161   :  { %v511_v61 = vadd.f32 %v2853_v46, %v489_v18  ;;  %v266_v20 = vpop.permute.xlu1 %265  ;;  %883 = vmatprep.subr.mxu1 %v776_v52  ;;  %v837_v18 = vld [vmem:[#allocation4 + $0xf8] sm:$0xff] }
 0x162   :  { %v291_v31 = vmul.f32 %v2835_v33, %v266_v20  ;;  %884 = vmatpush1.msra.mxu1 %v775_v15  ;;  %2038 = vmatprep.subr.mxu0 %v837_v18  ;;  %v820_v20 = vld [vmem:[#allocation4 + $0x70] sm:$0xff] }
 0x163   :  { %v527_v21 = vmax.f32 %v511_v61, 0.0  ;;  %885 = vmatprep.subr.mxu1 %v774_v16  ;;  %v836_v61 = vld [vmem:[#allocation4 + $0xf0] sm:$0xff]  ;;  %2039 = vmatpush3.msra.mxu0 %v821_v19 }
 0x164   :  { %886 = vmatpush1.msra.mxu1 %v773_v17  ;;  %2040 = vmatprep.subr.mxu0 %v836_v61 }
 0x165   :  { %2227 = vmatprep.mubr.msk.f32.mxu0 %vm537_vm0, %v527_v21  ;;  %2233 = vmatprep.subr.mxu1 %v2750_v11  ;;  %v835_v21 = vld [vmem:[#allocation4 + $0xe8] sm:$0xff]  ;;  %v816_v11 = vld [vmem:[#allocation4 + $0x50] sm:$0xff] }
 0x166   :  { %v351_v23 = vpop.permute.xlu1 %350  ;;  %2228 = vmatmul.mubr.msk.f32.gmra.mxu0 %vm537_vm0, %v528_v22  ;;  %v819_v22 = vld [vmem:[#allocation4 + $0x68] sm:$0xff] }
 0x167   :  { %v375_v27 = vmul.f32 %v2841_v36, %v351_v23  ;;  %2041 = vmatpush3.msra.mxu0 %v820_v20  ;;  %v834_v23 = vld [vmem:[#allocation4 + $0xe0] sm:$0xff] }
 0x168   :  { %2042 = vmatprep.subr.mxu0 %v835_v21 }
 0x169   :  { %v391_v35 = vadd.f32 %v375_v27, %v291_v31  ;;  %2043 = vmatpush3.msra.mxu0 %v819_v22  ;;  %v831_v27 = vld [vmem:[#allocation4 + $0xc8] sm:$0xff]  ;;  %v814_v31 = vld [vmem:[#allocation4 + $0x40] sm:$0xff] }
 0x16a   :  { %v355_v25 = vpop.permute.xlu1 %354  ;;  %2044 = vmatprep.subr.mxu0 %v834_v23 }
 0x16b   :  { %v376_v26 = vmul.f32 %v2841_v36, %v355_v25  ;;  %v833_v25 = vld [vmem:[#allocation4 + $0xd8] sm:$0xff]  ;;  %2045 = vmatpush3.msra.mxu0 %v818_v24 }
 0x16c   :  { %2046 = vmatprep.subr.mxu0 %v833_v25 }
 0x16d   :  { %v392_v30 = vadd.f32 %v376_v26, %v292_v62  ;;  %v817_v62 = vld [vmem:[#allocation4 + $0x58] sm:$0xff]  ;;  %v832_v26 = vld [vmem:[#allocation4 + $0xd0] sm:$0xff] }
 0x16e   :  { %2047 = vmatpush3.msra.mxu0 %v817_v62 }
 0x16f   :  { %v492_v34 = vadd.f32 %v476_v29, %v392_v30  ;;  %v451_v54 = vpop.permute.xlu1 %450  ;;  %2048 = vmatprep.subr.mxu0 %v832_v26  ;;  %v815_v29 = vld [vmem:[#allocation4 + $0x48] sm:$0xff]  ;;  %v830_v30 = vld [vmem:[#allocation4 + $0xc0] sm:$0xff] }
 0x170   :  { %v475_v37 = vmul.f32 %v2846_v41, %v451_v54  ;;  %2049 = vmatpush3.msra.mxu0 %v816_v11  ;;  %v813_v54 = vld [vmem:[#allocation4 + $0x38] sm:$0xff] }
 0x171   :  { %v514_v39 = vadd.f32 %v2853_v46, %v492_v34  ;;  %2050 = vmatprep.subr.mxu0 %v831_v27  ;;  %v829_v34 = vld [vmem:[#allocation4 + $0xb8] sm:$0xff] }
 0x172   :  { %v491_v38 = vadd.f32 %v475_v37, %v391_v35  ;;  %2051 = vmatpush3.msra.mxu0 %v815_v29  ;;  %v828_v35 = vld [vmem:[#allocation4 + $0xb0] sm:$0xff] }
 0x173   :  { %v530_v40 = vmax.f32 %v514_v39, 0.0  ;;  %2052 = vmatprep.subr.mxu0 %v830_v30  ;;  %v812_v37 = vld [vmem:[#allocation4 + $0x30] sm:$0xff]  ;;  %v811_v39 = vld [vmem:[#allocation4 + $0x28] sm:$0xff] }
 0x174   :  { %v513_v0 = vadd.f32 %v2853_v46, %v491_v38  ;;  %2053 = vmatpush3.msra.mxu0 %v814_v31  ;;  %v827_v38 = vld [vmem:[#allocation4 + $0xa8] sm:$0xff] }
 0x175   :  { %2054 = vmatprep.subr.mxu0 %v829_v34 }
 0x176   :  { %v529_v2 = vmax.f32 %v513_v0, 0.0  ;;  %2055 = vmatpush3.msra.mxu0 %v813_v54  ;;  %v3003_v0 = vpop.permute.xlu1 %1015 }
 0x177   :  { %2056 = vmatprep.subr.mxu0 %v828_v35  ;;  %v1021_v35 = vpop.permute.xlu0 %1020 }
 0x178   :  { %2230 = vmatprep.mubr.msk.f32.mxu0 %vm537_vm0, %v529_v2  ;;  %2057 = vmatpush3.msra.mxu0 %v812_v37  ;;  %v826_v2 = vld [vmem:[#allocation4 + $0xa0] sm:$0xff] }
 0x179   :  { %2231 = vmatmul.mubr.msk.f32.gmra.mxu0 %vm537_vm0, %v530_v40  ;;  %2058 = vmatprep.subr.mxu0 %v827_v38  ;;  %v810_v40 = vld [vmem:[#allocation4 + $0x20] sm:$0xff] }
 0x17a   :  { %2059 = vmatpush3.msra.mxu0 %v811_v39  ;;  %v3005_v42 = vpop.permute.xlu1 %1062 }
 0x17b   :  { %2060 = vmatprep.subr.mxu0 %v826_v2 }
 0x17c   :  { %2061 = vmatpush3.msra.mxu0 %v810_v40 }
 0x17e   :  { %v3007_v44 = vpop.permute.xlu1 %1066 }
 0x182   :  { %v3009_v47 = vpop.permute.xlu1 %1110 }
 0x187   :  { %v3011_v49 = vpop.permute.xlu1 %1025 }
 0x18c   :  { %v3013_v53 = vpop.permute.xlu1 %1070 }
 0x190   :  { %v3021_v60 = vpop.permute.xlu1 %1074 }
 0x195   :  { %v3030_v16 = vpop.permute.xlu1 %1118 }
 0x19a   :  { %v3032_v26 = vpop.permute.xlu1 %1035 }
 0x19f   :  { %v3040_v39 = vpop.permute.xlu1 %1078 }
 0x1d0   :  { %v2211_v43 = vpop.f32.mrf.mxu0 }
 0x1d1   :  { %v658_v4 = vadd.f32 %v2211_v43, %v3018_v56 }
 0x1d2   :  { %v652_v3 = vpop.f32.mrf.mxu0 }
 0x1d3   :  { %v653_v58 = vadd.f32 %v3018_v56, %v652_v3  ;;  %v732_v17 = vmax.f32 %v658_v4, 0.0 }
 0x1d4   :  { %v2214_v45 = vpop.f32.mrf.mxu0 }
 0x1d5   :  { %v668_v63 = vadd.f32 %v2214_v45, %v3018_v56  ;;  %v731_v12 = vmax.f32 %v653_v58, 0.0  ;;  %v1031_v58 = vpop.permute.xlu0 %1030 }
 0x1d6   :  { %v662_v48 = vpop.f32.mrf.mxu0 }
 0x1d7   :  { %v663_v57 = vadd.f32 %v3018_v56, %v662_v48  ;;  %v734_v13 = vmax.f32 %v668_v63, 0.0 }
 0x1d9   :  { %v733_v6 = vmax.f32 %v663_v57, 0.0  ;;  %v748_v21 = vmax.f32 %v732_v17, %v734_v13  ;;  %v1041_v17 = vpop.permute.xlu0 %1040 }
 0x1da   :  { %v2217_v7 = vpop.f32.mrf.mxu0 }
 0x1db   :  { %v678_v8 = vadd.f32 %v2217_v7, %v3018_v56  ;;  %v747_v18 = vmax.f32 %v731_v12, %v733_v6  ;;  %v1093_v12 = vmul.f32 %v3005_v42, %v2841_v36 }
 0x1dc   :  { %v672_v50 = vpop.f32.mrf.mxu0 }
 0x1dd   :  { %v673_v59 = vadd.f32 %v3018_v56, %v672_v50  ;;  %v736_v19 = vmax.f32 %v678_v8, 0.0 }
 0x1df   :  { %v735_v52 = vmax.f32 %v673_v59, 0.0  ;;  %v750_v25 = vmax.f32 %v748_v21, %v736_v19 }
 0x1e1   :  { %v749_v22 = vmax.f32 %v747_v18, %v735_v52 }
 0x1ed   :  { %v2220_v51 = vpop.f32.mrf.mxu0 }
 0x1ee   :  { %v688_v15 = vadd.f32 %v2220_v51, %v3018_v56 }
 0x1ef   :  { %v682_v55 = vpop.f32.mrf.mxu0 }
 0x1f0   :  { %v683_v9 = vadd.f32 %v3018_v56, %v682_v55  ;;  %v738_v23 = vmax.f32 %v688_v15, 0.0 }
 0x1f2   :  { %v737_v61 = vmax.f32 %v683_v9, 0.0  ;;  %v752_v11 = vmax.f32 %v750_v25, %v738_v23  ;;  %v1051_v25 = vpop.permute.xlu0 %1050 }
 0x1f4   :  { %v751_v62 = vmax.f32 %v749_v22, %v737_v61 }
 0x1f6   :  { %v753_v31 = vmax.f32 %v751_v62, %v752_v11 }
 0x1f8   :  { %v754_v43 = vrot.slane %v753_v31, 4 }
 0x1fa   :  { %v755_v4 = vmax.f32 %v753_v31, %v754_v43  ;;  %v1094_v31 = vmul.f32 %v3007_v44, %v2841_v36  ;;  %v2389_v44 = vld [vmem:[%s3288_s10 + $0x38] sm:$0xff] }
 0x1fc   :  { %v756_v15 = vrot.slane %v755_v4, 2 }
 0x1fe   :  { %v757_v23 = vmax.f32 %v755_v4, %v756_v15 }
 0x200   :  { %v2223_v5 = vpop.f32.mrf.mxu0  ;;  %v758_v11 = vrot.slane %v757_v23, 1 }
 0x201   :  { %v698_v34 = vadd.f32 %v2223_v5, %v3018_v56 }
 0x202   :  { %v692_v1 = vpop.f32.mrf.mxu0 }
 0x203   :  { %v693_v54 = vadd.f32 %v3018_v56, %v692_v1  ;;  %v740_v3 = vmax.f32 %v698_v34, 0.0  ;;  %v3044_v1 = vpop.permute.xlu1 %1082  ;;  %v1115_v34 = vpop.permute.xlu0 %1114 }
 0x205   :  { %v739_v48 = vmax.f32 %v693_v54, 0.0 }
 0x207   :  { %v1127_v19 = vpop.permute.xlu1 %1126 }
 0x213   :  { %v2226_v10 = vpop.f32.mrf.mxu0 }
 0x214   :  { %v708_v29 = vadd.f32 %v2226_v10, %v3018_v56  ;;  %v1053_v10 = vmul.f32 %v3003_v0, %v2835_v33  ;;  %v1046_v0 = vpop.permute.xlu1 %1045 }
 0x215   :  { %v702_v20 = vpop.f32.mrf.mxu0 }
 0x216   :  { %v703_v30 = vadd.f32 %v3018_v56, %v702_v20  ;;  %v742_v2 = vmax.f32 %v708_v29, 0.0  ;;  %v1101_v61 = vadd.f32 %v1093_v12, %v1053_v10  ;;  %v1141_v20 = vmul.f32 %v3009_v47, %v2846_v41 }
 0x217   :  { %v759_v47 = vmax.f32 %v757_v23, %v758_v11 }
 0x218   :  { %v741_v40 = vmax.f32 %v703_v30, 0.0  ;;  %v761_v5 = vmax.f32 %v740_v3, %v742_v2  ;;  %v1054_v30 = vmul.f32 %v1021_v35, %v2835_v33  ;;  %v1087_v2 = vpop.permute.xlu1 %1086  ;;  %v1142_v35 = vmul.f32 %v1115_v34, %v2846_v41 }
 0x219   :  { %v1099_v10 = vmul.f32 %v1087_v2, %v2841_v36 }
 0x21a   :  { %v760_v57 = vmax.f32 %v739_v48, %v741_v40  ;;  %v1102_v3 = vadd.f32 %v1094_v31, %v1054_v30 }
 0x226   :  { %v2229_v24 = vpop.f32.mrf.mxu0 }
 0x227   :  { %v718_v37 = vadd.f32 %v2229_v24, %v3018_v56  ;;  %v1149_v24 = vadd.f32 %v1141_v20, %v1101_v61  ;;  %v2394_v61 = vld [vmem:[%s3288_s10 + $0x10] sm:$0xff] }
 0x228   :  { %v712_v27 = vpop.f32.mrf.mxu0 }
 0x229   :  { %v713_v38 = vadd.f32 %v3018_v56, %v712_v27  ;;  %v744_v7 = vmax.f32 %v718_v37, 0.0  ;;  %v1157_v42 = vadd.f32 %v2853_v46, %v1149_v24  ;;  %v1055_v37 = vmul.f32 %v3011_v49, %v2835_v33  ;;  %v2395_v24 = vld [vmem:[%s3288_s10 + $0x8] sm:$0xff] }
 0x22a   :  { %v1056_v49 = vmul.f32 %v1031_v58, %v2835_v33 }
 0x22b   :  { %v743_v50 = vmax.f32 %v713_v38, 0.0  ;;  %v763_v6 = vmax.f32 %v761_v5, %v744_v7  ;;  %v1095_v38 = vmul.f32 %v3013_v53, %v2841_v36  ;;  %v1165_v40 = vmax.f32 %v1157_v42, 0.0  ;;  %v1091_v5 = vpop.permute.xlu1 %1090 }
 0x22c   :  { %v1096_v53 = vmul.f32 %v3021_v60, %v2841_v36  ;;  %v1143_v7 = vmul.f32 %v3030_v16, %v2846_v41  ;;  %v2391_v60 = vld [vmem:[%s3288_s10 + $0x28] sm:$0xff]  ;;  %v1058_v16 = vmul.f32 %v1041_v17, %v2835_v33 }
 0x22d   :  { %v762_v8 = vmax.f32 %v760_v57, %v743_v50  ;;  %v1103_v48 = vadd.f32 %v1095_v38, %v1055_v37  ;;  %v2390_v50 = vld [vmem:[%s3288_s10 + $0x30] sm:$0xff]  ;;  %v1150_v57 = vadd.f32 %v1142_v35, %v1102_v3  ;;  %v809_v3 = vld [vmem:[#allocation4 + $0x18] sm:$0xff] }
 0x22e   :  { %v824_v35 = vld [vmem:[#allocation4 + $0x90] sm:$0xff] }
 0x22f   :  { %v1135_v12 = vpop.permute.xlu1 %1134 }
 0x239   :  { %v2232_v45 = vpop.f32.mrf.mxu0 }
 0x23a   :  { %v728_v51 = vadd.f32 %v2232_v45, %v3018_v56  ;;  %v1123_v45 = vpop.permute.xlu0 %1122 }
 0x23b   :  { %v722_v55 = vpop.f32.mrf.mxu0  ;;  %v1144_v4 = vmul.f32 %v1123_v45, %v2846_v41  ;;  %v808_v45 = vld [vmem:[#allocation4 + $0x10] sm:$0xff] }
 0x23c   :  { %v746_v63 = vmax.f32 %v728_v51, 0.0  ;;  %v723_v59 = vadd.f32 %v3018_v56, %v722_v55  ;;  %v1057_v51 = vmul.f32 %v3032_v26, %v2835_v33  ;;  %v1097_v55 = vmul.f32 %v3040_v39, %v2841_v36  ;;  %v2392_v39 = vld [vmem:[%s3288_s10 + $0x20] sm:$0xff] }
 0x23d   :  { %v1098_v26 = vmul.f32 %v3044_v1, %v2841_v36  ;;  %v1060_v1 = vmul.f32 %v1051_v25, %v2835_v33 }
 0x23e   :  { %v745_v9 = vmax.f32 %v723_v59, 0.0  ;;  %v765_v13 = vmax.f32 %v763_v6, %v746_v63  ;;  %v1131_v58 = vpop.permute.xlu0 %1130  ;;  %v1104_v63 = vadd.f32 %v1096_v53, %v1056_v49  ;;  %v1151_v59 = vadd.f32 %v1143_v7, %v1103_v48  ;;  %v807_v49 = vld [vmem:[#allocation4 + $0x8] sm:$0xff]  ;;  %v806_v48 = vld [vmem:[#allocation4] sm:$0xff]  ;;  %v1359_v53 = vld [vmem:[#allocation6 + $0xf8] sm:$0xff] }
 0x23f   :  { %v1105_v6 = vadd.f32 %v1097_v55, %v1057_v51  ;;  %v1106_v17 = vadd.f32 %v1098_v26, %v1058_v16  ;;  %v805_v7 = vld [vmem:[%s3260_s7] sm:$0x3]  ;;  %v1355_v26 = vld [vmem:[#allocation6 + $0xd8] sm:$0xff] }
 0x240   :  { %v764_v52 = vmax.f32 %v762_v8, %v745_v9  ;;  %v1145_v8 = vmul.f32 %v1127_v19, %v2846_v41  ;;  %v1059_v9 = vmul.f32 %v1046_v0, %v2835_v33  ;;  %v1152_v15 = vadd.f32 %v1144_v4, %v1104_v63  ;;  %v1358_v63 = vld [vmem:[#allocation6 + $0xf0] sm:$0xff]  ;;  %v1356_v4 = vld [vmem:[#allocation6 + $0xe0] sm:$0xff] }
 0x241   :  { %v1100_v19 = vmul.f32 %v1091_v5, %v2841_v36  ;;  %v1159_v20 = vadd.f32 %v2853_v46, %v1151_v59  ;;  %v1147_v33 = vmul.f32 %v1135_v12, %v2846_v41  ;;  %v847_v51 = vrot.slane %v805_v7, %v2832_v32  ;;  %v1357_v59 = vld [vmem:[#allocation6 + $0xe8] sm:$0xff] }
 0x242   :  { %v766_v18 = vmax.f32 %v764_v52, %v765_v13  ;;  %v2393_v13 = vld [vmem:[%s3288_s10 + $0x18] sm:$0xff]  ;;  %v1158_v52 = vadd.f32 %v2853_v46, %v1150_v57  ;;  %v1139_v23 = vpop.permute.xlu0 %1138  ;;  %v1160_v36 = vadd.f32 %v2853_v46, %v1152_v15  ;;  %v1349_v12 = vld [vmem:[#allocation6 + $0xa8] sm:$0xff] }
 0x243   :  { %v1108_v0 = vadd.f32 %v1100_v19, %v1060_v1  ;;  %v1148_v11 = vmul.f32 %v1139_v23, %v2846_v41  ;;  %v1167_v42 = vmax.f32 %v1159_v20, 0.0  ;;  %v1348_v1 = vld [vmem:[#allocation6 + $0xa0] sm:$0xff]  ;;  %v1343_v23 = vld [vmem:[#allocation6 + $0x78] sm:$0xff] }
 0x244   :  { %v767_v21 = vrot.slane %v766_v18, 4  ;;  %v1166_v25 = vmax.f32 %v1158_v52, 0.0  ;;  %v1168_v31 = vmax.f32 %v1160_v36, 0.0  ;;  %v1347_v52 = vld [vmem:[#allocation6 + $0x98] sm:$0xff] }
 0x246   :  { %v768_v22 = vmax.f32 %v766_v18, %v767_v21  ;;  %v1146_v18 = vmul.f32 %v1131_v58, %v2846_v41  ;;  %v1153_v21 = vadd.f32 %v1145_v8, %v1105_v6  ;;  %v1353_v6 = vld [vmem:[#allocation6 + $0xc8] sm:$0xff]  ;;  %v1352_v8 = vld [vmem:[#allocation6 + $0xc0] sm:$0xff] }
 0x248   :  { %v769_v62 = vrot.slane %v768_v22, 2 }
 0x24a   :  { %v770_v27 = vmax.f32 %v768_v22, %v769_v62  ;;  %v1107_v22 = vadd.f32 %v1099_v10, %v1059_v9  ;;  %v1154_v62 = vadd.f32 %v1146_v18, %v1106_v17  ;;  %v1351_v9 = vld [vmem:[#allocation6 + $0xb8] sm:$0xff]  ;;  %v1350_v10 = vld [vmem:[#allocation6 + $0xb0] sm:$0xff]  ;;  %v1345_v18 = vld [vmem:[#allocation6 + $0x88] sm:$0xff] }
 0x24b   :  { %v1346_v17 = vld [vmem:[#allocation6 + $0x90] sm:$0xff] }
 0x24c   :  { %v771_v29 = vrot.slane %v770_v27, 1  ;;  %v1155_v30 = vadd.f32 %v1147_v33, %v1107_v22  ;;  %v1162_v34 = vadd.f32 %v2853_v46, %v1154_v62  ;;  %v1341_v62 = vld [vmem:[#allocation6 + $0x68] sm:$0xff] }
 0x24e   :  { %v772_v54 = vmax.f32 %v770_v27, %v771_v29  ;;  %v2396_v27 = vld [vmem:[%s3288_s10] sm:$0xff]  ;;  %v1161_v29 = vadd.f32 %v2853_v46, %v1153_v21  ;;  %v1163_v41 = vadd.f32 %v2853_v46, %v1155_v30  ;;  %v1170_v37 = vmax.f32 %v1162_v34, 0.0  ;;  %v1339_v30 = vld [vmem:[#allocation6 + $0x58] sm:$0xff]  ;;  %v1338_v34 = vld [vmem:[#allocation6 + $0x50] sm:$0xff] }
 0x250   :  { %v853_v43 = vsel %vm852_vm1, %v772_v54, %v759_v47  ;;  %v1156_v47 = vadd.f32 %v1148_v11, %v1108_v0  ;;  %v1169_v54 = vmax.f32 %v1161_v29, 0.0  ;;  %v1171_v2 = vmax.f32 %v1163_v41, 0.0  ;;  %v1340_v11 = vld [vmem:[#allocation6 + $0x60] sm:$0xff]  ;;  %v1337_v41 = vld [vmem:[#allocation6 + $0x48] sm:$0xff] }
 0x251   :  { %920 = vmatmul.mubr.f32.vlgmr.msra.gmra.mxu1 %v853_v43  ;;  %v825_v43 = vld [vmem:[#allocation4 + $0x98] sm:$0xff] }
 0x252   :  { %2234 = vmatpush3.msra.mxu1 %v2389_v44  ;;  %2249 = vmatprep.mubr.msk.f32.mxu1 %vm537_vm0, %v1165_v40  ;;  %v1164_v38 = vadd.f32 %v2853_v46, %v1156_v47  ;;  %v823_v44 = vld [vmem:[#allocation4 + $0x88] sm:$0xff]  ;;  %v822_v46 = vld [vmem:[#allocation4 + $0x80] sm:$0xff] }
 0x253   :  { %2235 = vmatprep.subr.mxu1 %v2390_v50  ;;  %2062 = vmatprep.subr.mxu0 %v825_v43 }
 0x254   :  { %2236 = vmatpush3.msra.mxu1 %v2390_v50  ;;  %v1172_v40 = vmax.f32 %v1164_v38, 0.0  ;;  %2063 = vmatpush3.msra.mxu0 %v809_v3  ;;  %v843_v50 = vrot.slane %v805_v7, %v2826_v28  ;;  %v1336_v38 = vld [vmem:[#allocation6 + $0x40] sm:$0xff] }
 0x255   :  { %2237 = vmatprep.subr.mxu1 %v2391_v60  ;;  %2064 = vmatprep.subr.mxu0 %v824_v35  ;;  %v1335_v35 = vld [vmem:[#allocation6 + $0x38] sm:$0xff]  ;;  %v1332_v7 = vld [vmem:[#allocation6 + $0x20] sm:$0xff] }
 0x256   :  { %2238 = vmatpush3.msra.mxu1 %v2391_v60  ;;  %2065 = vmatpush3.msra.mxu0 %v808_v45 }
 0x257   :  { %2239 = vmatprep.subr.mxu1 %v2392_v39  ;;  %2066 = vmatprep.subr.mxu0 %v823_v44  ;;  %v1334_v44 = vld [vmem:[#allocation6 + $0x30] sm:$0xff] }
 0x258   :  { %2240 = vmatpush3.msra.mxu1 %v2392_v39  ;;  %2067 = vmatpush3.msra.mxu0 %v807_v49  ;;  %v1354_v39 = vld [vmem:[#allocation6 + $0xd0] sm:$0xff] }
 0x259   :  { %2241 = vmatprep.subr.mxu1 %v2393_v13  ;;  %2068 = vmatprep.subr.mxu0 %v822_v46 }
 0x25a   :  { %2242 = vmatpush3.msra.mxu1 %v2393_v13  ;;  %2069 = vmatpush3.msra.mxu0 %v806_v48 }
 0x25b   :  { %2243 = vmatprep.subr.mxu1 %v2394_v61  ;;  %1409 = vmatprep.subr.mxu0 %v1359_v53  ;;  %v1333_v53 = vld [vmem:[#allocation6 + $0x28] sm:$0xff] }
 0x25c   :  { %2244 = vmatpush3.msra.mxu1 %v2394_v61  ;;  %v1344_v61 = vld [vmem:[#allocation6 + $0x80] sm:$0xff] }
 0x25d   :  { %2245 = vmatprep.subr.mxu1 %v2395_v24 }
 0x25e   :  { %2246 = vmatpush3.msra.mxu1 %v2395_v24  ;;  %v1342_v24 = vld [vmem:[#allocation6 + $0x70] sm:$0xff] }
 0x25f   :  { %2247 = vmatprep.subr.mxu1 %v2396_v27 }
 0x260   :  { %2248 = vmatpush3.msra.mxu1 %v2396_v27 }
 0x261   :  { %2250 = vmatmul.mubr.msk.f32.vlgmr.msra.gmra.mxu1 %vm537_vm0, %v1166_v25 }
 0x262   :  { %2252 = vmatprep.mubr.msk.f32.mxu1 %vm537_vm0, %v1167_v42 }
 0x265   :  { %2253 = vmatmul.mubr.msk.f32.gmra.mxu1 %vm537_vm0, %v1168_v31 }
 0x266   :  { %2255 = vmatprep.mubr.msk.f32.mxu1 %vm537_vm0, %v1169_v54 }
 0x269   :  { %2256 = vmatmul.mubr.msk.f32.gmra.mxu1 %vm537_vm0, %v1170_v37 }
 0x26a   :  { %2258 = vmatprep.mubr.msk.f32.mxu1 %vm537_vm0, %v1171_v2 }
 0x26d   :  { %2259 = vmatmul.mubr.msk.f32.gmra.mxu1 %vm537_vm0, %v1172_v40 }
 0x311   :  { %v921_v55 = vpop.f32.mrf.mxu1 }
 0x312   :  { %v922_v5 = vadd.f32 %v921_v55, %v843_v50 }
 0x313   :  { %v923_v60 = vpop.f32.mrf.mxu1 }
 0x314   :  { %v924_v16 = vadd.f32 %v923_v60, %v847_v51  ;;  %v926_v58 = vmax.f32 %v922_v5, 0.0  ;;  %v1331_v60 = vld [vmem:[#allocation6 + $0x18] sm:$0xff] }
 0x316   :  { %v927_v57 = vmax.f32 %v924_v16, 0.0  ;;  %v1330_v16 = vld [vmem:[#allocation6 + $0x10] sm:$0xff] }
 0x318   :  { %998 = vmatprep.mubr.f32.mxu0 %v927_v57 }
 0x319   :  { %999 = vmatmul.mubr.f32.vlgmr.msra.gmra.mxu0 %v926_v58 }
 0x31a   :  { %1410 = vmatpush1.msra.mxu0 %v1358_v63  ;;  %1473 = vmatprep.mubr.f32.mxu0 %v2559_v14  ;;  %v1329_v63 = vld [vmem:[#allocation6 + $0x8] sm:$0xff] }
 0x31b   :  { %1411 = vmatprep.subr.mxu0 %v1357_v59  ;;  %v1328_v59 = vld [vmem:[#allocation6] sm:$0xff] }
 0x31c   :  { %1412 = vmatpush1.msra.mxu0 %v1356_v4 }
 0x31d   :  { %1413 = vmatprep.subr.mxu0 %v1355_v26 }
 0x31e   :  { %1414 = vmatpush1.msra.mxu0 %v1354_v39 }
 0x31f   :  { %1415 = vmatprep.subr.mxu0 %v1353_v6 }
 0x320   :  { %1416 = vmatpush1.msra.mxu0 %v1352_v8 }
 0x321   :  { %v2251_v13 = vpop.f32.mrf.mxu1  ;;  %1417 = vmatprep.subr.mxu0 %v1351_v9 }
 0x322   :  { %1418 = vmatpush1.msra.mxu0 %v1350_v10  ;;  %v1269_v20 = vadd.f32 %v2251_v13, %v3018_v56 }
 0x323   :  { %v1263_v15 = vpop.f32.mrf.mxu1  ;;  %1419 = vmatprep.subr.mxu0 %v1349_v12 }
 0x324   :  { %1420 = vmatpush1.msra.mxu0 %v1348_v1  ;;  %v1264_v21 = vadd.f32 %v3018_v56, %v1263_v15  ;;  %v1303_v27 = vmax.f32 %v1269_v20, 0.0  ;;  %v1392_v15 = vld [vmem:[#allocation7 + $0xf8] sm:$0xff]  ;;  %v1374_v20 = vld [vmem:[#allocation7 + $0x68] sm:$0xff] }
 0x325   :  { %v2254_v19 = vpop.f32.mrf.mxu1  ;;  %1421 = vmatprep.subr.mxu0 %v1347_v52  ;;  %2089 = vmatprep.subr.mxu1 %v1392_v15  ;;  %v1567_v15 = vld [vmem:[%s3267_s14 + $0x40] sm:$0xff] }
 0x326   :  { %v1279_v22 = vadd.f32 %v2254_v19, %v3018_v56  ;;  %1422 = vmatpush1.msra.mxu0 %v1346_v17  ;;  %v1302_v42 = vmax.f32 %v1264_v21, 0.0  ;;  %v1376_v17 = vld [vmem:[#allocation7 + $0x78] sm:$0xff]  ;;  %v1375_v19 = vld [vmem:[#allocation7 + $0x70] sm:$0xff]  ;;  %v1389_v21 = vld [vmem:[#allocation7 + $0xe0] sm:$0xff] }
 0x327   :  { %v1273_v33 = vpop.f32.mrf.mxu1  ;;  %1423 = vmatprep.subr.mxu0 %v1345_v18  ;;  %v1391_v18 = vld [vmem:[#allocation7 + $0xf0] sm:$0xff]  ;;  %2090 = vmatpush3.msra.mxu1 %v1376_v17  ;;  %v1566_v17 = vld [vmem:[%s3267_s14 + $0x38] sm:$0xff] }
 0x328   :  { %v1305_v25 = vmax.f32 %v1279_v22, 0.0  ;;  %v1274_v36 = vadd.f32 %v3018_v56, %v1273_v33  ;;  %1424 = vmatpush1.msra.mxu0 %v1344_v61  ;;  %v1390_v61 = vld [vmem:[#allocation7 + $0xe8] sm:$0xff]  ;;  %2091 = vmatprep.subr.mxu1 %v1391_v18  ;;  %v1373_v22 = vld [vmem:[#allocation7 + $0x60] sm:$0xff]  ;;  %v1372_v33 = vld [vmem:[#allocation7 + $0x58] sm:$0xff] }
 0x329   :  { %v2257_v0 = vpop.f32.mrf.mxu1  ;;  %1425 = vmatprep.subr.mxu0 %v1343_v23  ;;  %2092 = vmatpush3.msra.mxu1 %v1375_v19  ;;  %v1388_v23 = vld [vmem:[#allocation7 + $0xd8] sm:$0xff]  ;;  %v1565_v18 = vld [vmem:[%s3267_s14 + $0x30] sm:$0xff]  ;;  %v1564_v19 = vld [vmem:[%s3267_s14 + $0x28] sm:$0xff] }
 0x32a   :  { %v1304_v29 = vmax.f32 %v1274_v36, 0.0  ;;  %1426 = vmatpush1.msra.mxu0 %v1342_v24  ;;  %v1311_v47 = vmax.f32 %v1303_v27, %v1305_v25  ;;  %v1289_v40 = vadd.f32 %v2257_v0, %v3018_v56  ;;  %2093 = vmatprep.subr.mxu1 %v1390_v61  ;;  %v1387_v24 = vld [vmem:[#allocation7 + $0xd0] sm:$0xff]  ;;  %v1386_v36 = vld [vmem:[#allocation7 + $0xc8] sm:$0xff]  ;;  %v1385_v0 = vld [vmem:[#allocation7 + $0xc0] sm:$0xff] }
 0x32b   :  { %v1283_v31 = vpop.f32.mrf.mxu1  ;;  %1427 = vmatprep.subr.mxu0 %v1341_v62  ;;  %2094 = vmatpush3.msra.mxu1 %v1374_v20  ;;  %v1371_v25 = vld [vmem:[#allocation7 + $0x50] sm:$0xff]  ;;  %v1370_v62 = vld [vmem:[#allocation7 + $0x48] sm:$0xff]  ;;  %v1384_v27 = vld [vmem:[#allocation7 + $0xb8] sm:$0xff] }
 0x32c   :  { %v1310_v54 = vmax.f32 %v1302_v42, %v1304_v29  ;;  %1428 = vmatpush1.msra.mxu0 %v1340_v11  ;;  %v1284_v43 = vadd.f32 %v3018_v56, %v1283_v31  ;;  %v1307_v51 = vmax.f32 %v1289_v40, 0.0  ;;  %2095 = vmatprep.subr.mxu1 %v1389_v21  ;;  %v1369_v11 = vld [vmem:[#allocation7 + $0x40] sm:$0xff]  ;;  %v1368_v42 = vld [vmem:[#allocation7 + $0x38] sm:$0xff]  ;;  %v1383_v29 = vld [vmem:[#allocation7 + $0xb0] sm:$0xff] }
 0x32d   :  { %v2260_v37 = vpop.f32.mrf.mxu1  ;;  %1429 = vmatprep.subr.mxu0 %v1339_v30  ;;  %2096 = vmatpush3.msra.mxu1 %v1373_v22  ;;  %v1367_v30 = vld [vmem:[#allocation7 + $0x30] sm:$0xff]  ;;  %v1382_v31 = vld [vmem:[#allocation7 + $0xa8] sm:$0xff]  ;;  %v1563_v61 = vld [vmem:[%s3267_s14 + $0x20] sm:$0xff] }
 0x32e   :  { %v1312_v2 = vmax.f32 %v1310_v54, %v1311_v47  ;;  %v1299_v3 = vadd.f32 %v2260_v37, %v3018_v56  ;;  %1430 = vmatpush1.msra.mxu0 %v1338_v34  ;;  %v1306_v55 = vmax.f32 %v1284_v43, 0.0  ;;  %2097 = vmatprep.subr.mxu1 %v1388_v23  ;;  %v1366_v34 = vld [vmem:[#allocation7 + $0x28] sm:$0xff]  ;;  %v1381_v47 = vld [vmem:[#allocation7 + $0xa0] sm:$0xff]  ;;  %v1364_v37 = vld [vmem:[#allocation7 + $0x18] sm:$0xff] }
 0x32f   :  { %v1293_v45 = vpop.f32.mrf.mxu1  ;;  %1431 = vmatprep.subr.mxu0 %v1337_v41  ;;  %2098 = vmatpush3.msra.mxu1 %v1372_v33  ;;  %v1365_v54 = vld [vmem:[#allocation7 + $0x20] sm:$0xff]  ;;  %v1380_v41 = vld [vmem:[#allocation7 + $0x98] sm:$0xff]  ;;  %v1378_v40 = vld [vmem:[#allocation7 + $0x88] sm:$0xff] }
 0x330   :  { %v1313_v49 = vrot.slane %v1312_v2, 4  ;;  %v1309_v46 = vmax.f32 %v1299_v3, 0.0  ;;  %v1294_v48 = vadd.f32 %v3018_v56, %v1293_v45  ;;  %1432 = vmatpush1.msra.mxu0 %v1336_v38  ;;  %2099 = vmatprep.subr.mxu1 %v1387_v24  ;;  %v1379_v38 = vld [vmem:[#allocation7 + $0x90] sm:$0xff]  ;;  %v1362_v43 = vld [vmem:[#allocation7 + $0x8] sm:$0xff]  ;;  %v1377_v3 = vld [vmem:[#allocation7 + $0x80] sm:$0xff] }
 0x331   :  { %1433 = vmatprep.subr.mxu0 %v1335_v35  ;;  %2100 = vmatpush3.msra.mxu1 %v1371_v25  ;;  %v1361_v35 = vld [vmem:[#allocation7] sm:$0xff]  ;;  %v1590_v45 = vld [vmem:[#allocation9 + $0x78] sm:$0xff]  ;;  %v1561_v23 = vld [vmem:[%s3267_s14 + $0x10] sm:$0xff] }
 0x332   :  { %v1314_v50 = vmax.f32 %v1312_v2, %v1313_v49  ;;  %v1308_v5 = vmax.f32 %v1294_v48, 0.0  ;;  %1434 = vmatpush1.msra.mxu0 %v1334_v44  ;;  %v1320_v57 = vmax.f32 %v1307_v51, %v1309_v46  ;;  %2101 = vmatprep.subr.mxu1 %v1386_v36  ;;  %v1363_v2 = vld [vmem:[#allocation7 + $0x10] sm:$0xff]  ;;  %v1588_v49 = vld [vmem:[#allocation9 + $0x68] sm:$0xff]  ;;  %v1587_v46 = vld [vmem:[#allocation9 + $0x60] sm:$0xff] }
 0x333   :  { %1435 = vmatprep.subr.mxu0 %v1333_v53  ;;  %2102 = vmatpush3.msra.mxu1 %v1370_v62  ;;  %v1589_v44 = vld [vmem:[#allocation9 + $0x70] sm:$0xff]  ;;  %v1586_v48 = vld [vmem:[#allocation9 + $0x58] sm:$0xff]  ;;  %v2001_v22 = vld [vmem:[%s3262_s9] ss:$0 sm:$0xff] }
 0x334   :  { %v1319_v58 = vmax.f32 %v1306_v55, %v1308_v5  ;;  %1436 = vmatpush1.msra.mxu0 %v1332_v7  ;;  %v1315_v4 = vrot.slane %v1314_v50, 2  ;;  %2103 = vmatprep.subr.mxu1 %v1385_v0  ;;  %v1585_v53 = vld [vmem:[#allocation9 + $0x50] sm:$0xff]  ;;  %v1584_v7 = vld [vmem:[#allocation9 + $0x48] sm:$0xff]  ;;  %v1582_v51 = vld [vmem:[#allocation9 + $0x38] sm:$0xff] }
 0x335   :  { %1437 = vmatprep.subr.mxu0 %v1331_v60  ;;  %2104 = vmatpush3.msra.mxu1 %v1369_v11  ;;  %v1581_v55 = vld [vmem:[#allocation9 + $0x30] sm:$0xff]  ;;  %v1580_v5 = vld [vmem:[#allocation9 + $0x28] sm:$0xff]  ;;  %v1562_v21 = vld [vmem:[%s3267_s14 + $0x18] sm:$0xff] }
 0x336   :  { %v1321_v56 = vmax.f32 %v1319_v58, %v1320_v57  ;;  %1438 = vmatpush1.msra.mxu0 %v1330_v16  ;;  %v1316_v39 = vmax.f32 %v1314_v50, %v1315_v4  ;;  %2105 = vmatprep.subr.mxu1 %v1384_v27  ;;  %v1583_v50 = vld [vmem:[#allocation9 + $0x40] sm:$0xff]  ;;  %v1560_v24 = vld [vmem:[%s3267_s14 + $0x8] sm:$0xff]  ;;  %v1578_v0 = vld [vmem:[#allocation9 + $0x18] sm:$0xff] }
 0x337   :  { %1439 = vmatprep.subr.mxu0 %v1329_v63  ;;  %2106 = vmatpush3.msra.mxu1 %v1368_v42  ;;  %v1360_v16 = vld [vmem:[%s3264_s11] sm:$0x3]  ;;  %v1577_v11 = vld [vmem:[#allocation9 + $0x10] sm:$0xff]  ;;  %v1576_v27 = vld [vmem:[#allocation9 + $0x8] sm:$0xff] }
 0x338   :  { %v1322_v26 = vrot.slane %v1321_v56, 4  ;;  %1440 = vmatpush1.msra.mxu0 %v1328_v59  ;;  %v1317_v10 = vrot.slane %v1316_v39, 1  ;;  %2107 = vmatprep.subr.mxu1 %v1383_v29  ;;  %v1398_v58 = vrot.slane %v1360_v16, %v2826_v28  ;;  %v1402_v63 = vrot.slane %v1360_v16, %v2832_v32  ;;  %v1559_v25 = vld [vmem:[%s3267_s14] sm:$0xff]  ;;  %v1771_v29 = vld [vmem:[#allocation10 + $0xf8] sm:$0xff]  ;;  %v1750_v16 = vld [vmem:[#allocation10 + $0x50] sm:$0xff] }
 0x339   :  { %2261 = vmatprep.subr.mxu0 %v2559_v14  ;;  %2108 = vmatpush3.msra.mxu1 %v1367_v30  ;;  %v1579_v62 = vld [vmem:[#allocation9 + $0x20] sm:$0xff] }
 0x33a   :  { %v1323_v6 = vmax.f32 %v1321_v56, %v1322_v26  ;;  %v1318_v13 = vmax.f32 %v1316_v39, %v1317_v10  ;;  %2109 = vmatprep.subr.mxu1 %v1382_v31  ;;  %v1572_v10 = vld [vmem:[%s3267_s14 + $0x68] sm:$0xff]  ;;  %v1575_v42 = vld [vmem:[#allocation9] sm:$0xff] }
 0x33b   :  { %2110 = vmatpush3.msra.mxu1 %v1366_v34  ;;  %v2010_v31 = vld [vmem:[%s3266_s13] ss:$0 sm:$0xff] }
 0x33c   :  { %v1324_v8 = vrot.slane %v1323_v6, 2  ;;  %2111 = vmatprep.subr.mxu1 %v1381_v47 }
 0x33d   :  { %2112 = vmatpush3.msra.mxu1 %v1365_v54 }
 0x33e   :  { %v1325_v9 = vmax.f32 %v1323_v6, %v1324_v8  ;;  %2113 = vmatprep.subr.mxu1 %v1380_v41  ;;  %v1574_v8 = vld [vmem:[%s3267_s14 + $0x78] sm:$0xff] }
 0x33f   :  { %2114 = vmatpush3.msra.mxu1 %v1364_v37  ;;  %v1770_v37 = vld [vmem:[#allocation10 + $0xf0] sm:$0xff] }
 0x340   :  { %v1326_v12 = vrot.slane %v1325_v9, 1  ;;  %2115 = vmatprep.subr.mxu1 %v1379_v38  ;;  %v1769_v38 = vld [vmem:[#allocation10 + $0xe8] sm:$0xff] }
 0x341   :  { %2116 = vmatpush3.msra.mxu1 %v1363_v2  ;;  %v1768_v2 = vld [vmem:[#allocation10 + $0xe0] sm:$0xff] }
 0x342   :  { %v1327_v1 = vmax.f32 %v1325_v9, %v1326_v12  ;;  %2117 = vmatprep.subr.mxu1 %v1378_v40  ;;  %v1573_v9 = vld [vmem:[%s3267_s14 + $0x70] sm:$0xff]  ;;  %v1571_v12 = vld [vmem:[%s3267_s14 + $0x60] sm:$0xff]  ;;  %v1767_v40 = vld [vmem:[#allocation10 + $0xd8] sm:$0xff] }
 0x343   :  { %2118 = vmatpush3.msra.mxu1 %v1362_v43  ;;  %v1766_v43 = vld [vmem:[#allocation10 + $0xd0] sm:$0xff] }
 0x344   :  { %v1407_v52 = vsel %vm852_vm1, %v1327_v1, %v1318_v13  ;;  %2119 = vmatprep.subr.mxu1 %v1377_v3  ;;  %v1570_v13 = vld [vmem:[%s3267_s14 + $0x58] sm:$0xff]  ;;  %v1569_v1 = vld [vmem:[%s3267_s14 + $0x50] sm:$0xff]  ;;  %v1765_v3 = vld [vmem:[#allocation10 + $0xc8] sm:$0xff] }
 0x345   :  { %1474 = vmatmul.mubr.f32.vlgmr.msra.gmra.mxu0 %v1407_v52  ;;  %2120 = vmatpush3.msra.mxu1 %v1361_v35  ;;  %v1568_v52 = vld [vmem:[%s3267_s14 + $0x48] sm:$0xff]  ;;  %v1764_v35 = vld [vmem:[#allocation10 + $0xc0] sm:$0xff] }
 0x346   :  { %2296 = vmatprep.subr.mxu1 %v2559_v14  ;;  %2293 = vmatprep.mubr.msk.f32.mxu0 %vm2560_vm2, %v2559_v14 }
 0x347   :  { %2262 = vmatpush3.msra.mxu0 %v1590_v45  ;;  %v1763_v45 = vld [vmem:[#allocation10 + $0xb8] sm:$0xff] }
 0x348   :  { %2263 = vmatprep.subr.mxu0 %v2559_v14 }
 0x349   :  { %2264 = vmatpush3.msra.mxu0 %v1589_v44  ;;  %v1762_v44 = vld [vmem:[#allocation10 + $0xb0] sm:$0xff] }
 0x34a   :  { %2265 = vmatprep.subr.mxu0 %v2559_v14 }
 0x34b   :  { %2266 = vmatpush3.msra.mxu0 %v1588_v49  ;;  %v1761_v49 = vld [vmem:[#allocation10 + $0xa8] sm:$0xff] }
 0x34c   :  { %2267 = vmatprep.subr.mxu0 %v2559_v14 }
 0x34d   :  { %2268 = vmatpush3.msra.mxu0 %v1587_v46  ;;  %v1760_v46 = vld [vmem:[#allocation10 + $0xa0] sm:$0xff] }
 0x34e   :  { %2269 = vmatprep.subr.mxu0 %v2559_v14 }
 0x34f   :  { %2270 = vmatpush3.msra.mxu0 %v1586_v48  ;;  %v1759_v48 = vld [vmem:[#allocation10 + $0x98] sm:$0xff] }
 0x350   :  { %2271 = vmatprep.subr.mxu0 %v2559_v14 }
 0x351   :  { %2272 = vmatpush3.msra.mxu0 %v1585_v53  ;;  %v1758_v53 = vld [vmem:[#allocation10 + $0x90] sm:$0xff] }
 0x352   :  { %2273 = vmatprep.subr.mxu0 %v2559_v14 }
 0x353   :  { %2274 = vmatpush3.msra.mxu0 %v1584_v7  ;;  %v1756_v7 = vld [vmem:[#allocation10 + $0x80] sm:$0xff] }
 0x354   :  { %2275 = vmatprep.subr.mxu0 %v2559_v14 }
 0x355   :  { %2276 = vmatpush3.msra.mxu0 %v1583_v50  ;;  %v1755_v50 = vld [vmem:[#allocation10 + $0x78] sm:$0xff] }
 0x356   :  { %2277 = vmatprep.subr.mxu0 %v2559_v14 }
 0x357   :  { %2278 = vmatpush3.msra.mxu0 %v1582_v51  ;;  %v1754_v51 = vld [vmem:[#allocation10 + $0x70] sm:$0xff] }
 0x358   :  { %2279 = vmatprep.subr.mxu0 %v2559_v14 }
 0x359   :  { %2280 = vmatpush3.msra.mxu0 %v1581_v55  ;;  %v1753_v55 = vld [vmem:[#allocation10 + $0x68] sm:$0xff] }
 0x35a   :  { %2281 = vmatprep.subr.mxu0 %v2559_v14 }
 0x35b   :  { %2282 = vmatpush3.msra.mxu0 %v1580_v5  ;;  %v1752_v5 = vld [vmem:[#allocation10 + $0x60] sm:$0xff] }
 0x35c   :  { %2283 = vmatprep.subr.mxu0 %v2559_v14 }
 0x35d   :  { %2284 = vmatpush3.msra.mxu0 %v1579_v62  ;;  %v1864_v62 = vld [vmem:[#allocation12 + $0x38] sm:$0xff] }
 0x35e   :  { %2285 = vmatprep.subr.mxu0 %v2559_v14 }
 0x35f   :  { %2286 = vmatpush3.msra.mxu0 %v1578_v0  ;;  %v1879_v0 = vld [vmem:[#allocation12 + $0xb0] sm:$0xff] }
 0x360   :  { %2287 = vmatprep.subr.mxu0 %v2559_v14 }
 0x361   :  { %2288 = vmatpush3.msra.mxu0 %v1577_v11  ;;  %v1863_v11 = vld [vmem:[#allocation12 + $0x30] sm:$0xff] }
 0x362   :  { %2289 = vmatprep.subr.mxu0 %v2559_v14 }
 0x363   :  { %2290 = vmatpush3.msra.mxu0 %v1576_v27  ;;  %v1878_v27 = vld [vmem:[#allocation12 + $0xa8] sm:$0xff] }
 0x364   :  { %2291 = vmatprep.subr.mxu0 %v2559_v14 }
 0x365   :  { %2292 = vmatpush3.msra.mxu0 %v1575_v42  ;;  %v1862_v42 = vld [vmem:[#allocation12 + $0x28] sm:$0xff] }
 0x366   :  { %1784 = vmatprep.subr.mxu0 %v1771_v29  ;;  %v1877_v29 = vld [vmem:[#allocation12 + $0xa0] sm:$0xff] }
 0x3d9   :  { %v2070_v60 = vpop.f32.mrf.mxu0 }
 0x3db   :  { %v2071_v57 = vpop.f32.mrf.mxu0 }
 0x3dc   :  { %v2072_v20 = vadd.f32 %v2071_v57, %v2070_v60  ;;  %v1751_v60 = vld [vmem:[#allocation10 + $0x58] sm:$0xff]  ;;  %v1749_v57 = vld [vmem:[#allocation10 + $0x48] sm:$0xff] }
 0x3de   :  { %v1001_v33 = vadd.f32 %v2072_v20, %v2001_v22  ;;  %v1868_v20 = vld [vmem:[#allocation12 + $0x58] sm:$0xff]  ;;  %v1867_v22 = vld [vmem:[#allocation12 + $0x50] sm:$0xff] }
 0x3e0   :  { %v1004_v36 = vmax.f32 %v1001_v33, 0.0  ;;  %v1866_v33 = vld [vmem:[#allocation12 + $0x48] sm:$0xff] }
 0x405   :  { %v1475_v59 = vpop.f32.mrf.mxu0 }
 0x406   :  { %v1476_v4 = vadd.f32 %v1475_v59, %v1398_v58  ;;  %v1748_v58 = vld [vmem:[#allocation10 + $0x40] sm:$0xff] }
 0x407   :  { %v1477_v56 = vpop.f32.mrf.mxu0 }
 0x408   :  { %v1478_v26 = vadd.f32 %v1477_v56, %v1402_v63  ;;  %v1480_v6 = vmax.f32 %v1476_v4, 0.0  ;;  %v1747_v63 = vld [vmem:[#allocation10 + $0x38] sm:$0xff]  ;;  %v1746_v56 = vld [vmem:[#allocation10 + $0x30] sm:$0xff] }
 0x40a   :  { %v1481_v39 = vmax.f32 %v1478_v26, 0.0  ;;  %v1745_v26 = vld [vmem:[#allocation10 + $0x28] sm:$0xff] }
 0x40c   :  { %1552 = vmatprep.mubr.f32.mxu1 %v1481_v39  ;;  %v1744_v39 = vld [vmem:[#allocation10 + $0x20] sm:$0xff] }
 0x40d   :  { %1553 = vmatmul.mubr.f32.vlgmr.msra.gmra.mxu1 %v1480_v6  ;;  %v1743_v6 = vld [vmem:[#allocation10 + $0x18] sm:$0xff] }
 0x40e   :  { %2297 = vmatpush3.msra.mxu1 %v1574_v8  ;;  %2328 = vmatprep.mubr.msk.f32.mxu1 %vm2560_vm2, %v2559_v14  ;;  %v1742_v8 = vld [vmem:[#allocation10 + $0x10] sm:$0xff] }
 0x40f   :  { %2298 = vmatprep.subr.mxu1 %v2559_v14 }
 0x410   :  { %2299 = vmatpush3.msra.mxu1 %v1573_v9  ;;  %v1741_v9 = vld [vmem:[#allocation10 + $0x8] sm:$0xff] }
 0x411   :  { %2300 = vmatprep.subr.mxu1 %v2559_v14 }
 0x412   :  { %2301 = vmatpush3.msra.mxu1 %v1572_v10  ;;  %v1740_v10 = vld [vmem:[#allocation10] sm:$0xff] }
 0x413   :  { %2302 = vmatprep.subr.mxu1 %v2559_v14 }
 0x414   :  { %2303 = vmatpush3.msra.mxu1 %v1571_v12  ;;  %v1888_v12 = vld [vmem:[#allocation12 + $0xf8] sm:$0xff] }
 0x415   :  { %2304 = vmatprep.subr.mxu1 %v2559_v14 }
 0x416   :  { %2305 = vmatpush3.msra.mxu1 %v1570_v13  ;;  %v1872_v13 = vld [vmem:[#allocation12 + $0x78] sm:$0xff] }
 0x417   :  { %2306 = vmatprep.subr.mxu1 %v2559_v14 }
 0x418   :  { %2307 = vmatpush3.msra.mxu1 %v1569_v1  ;;  %v1887_v1 = vld [vmem:[#allocation12 + $0xf0] sm:$0xff] }
 0x419   :  { %2308 = vmatprep.subr.mxu1 %v2559_v14 }
 0x41a   :  { %2309 = vmatpush3.msra.mxu1 %v1568_v52  ;;  %v1871_v52 = vld [vmem:[#allocation12 + $0x70] sm:$0xff] }
 0x41b   :  { %2310 = vmatprep.subr.mxu1 %v2559_v14 }
 0x41c   :  { %2311 = vmatpush3.msra.mxu1 %v1567_v15  ;;  %v1886_v15 = vld [vmem:[#allocation12 + $0xe8] sm:$0xff] }
 0x41d   :  { %2312 = vmatprep.subr.mxu1 %v2559_v14 }
 0x41e   :  { %2313 = vmatpush3.msra.mxu1 %v1566_v17  ;;  %v1870_v17 = vld [vmem:[#allocation12 + $0x68] sm:$0xff] }
 0x41f   :  { %2314 = vmatprep.subr.mxu1 %v2559_v14 }
 0x420   :  { %2315 = vmatpush3.msra.mxu1 %v1565_v18  ;;  %v1885_v18 = vld [vmem:[#allocation12 + $0xe0] sm:$0xff] }
 0x421   :  { %2316 = vmatprep.subr.mxu1 %v2559_v14 }
 0x422   :  { %2317 = vmatpush3.msra.mxu1 %v1564_v19  ;;  %v1869_v19 = vld [vmem:[#allocation12 + $0x60] sm:$0xff] }
 0x423   :  { %2318 = vmatprep.subr.mxu1 %v2559_v14 }
 0x424   :  { %2319 = vmatpush3.msra.mxu1 %v1563_v61  ;;  %v1884_v61 = vld [vmem:[#allocation12 + $0xd8] sm:$0xff] }
 0x425   :  { %2320 = vmatprep.subr.mxu1 %v2559_v14 }
 0x426   :  { %2321 = vmatpush3.msra.mxu1 %v1562_v21  ;;  %v1883_v21 = vld [vmem:[#allocation12 + $0xd0] sm:$0xff] }
 0x427   :  { %2322 = vmatprep.subr.mxu1 %v2559_v14 }
 0x428   :  { %2323 = vmatpush3.msra.mxu1 %v1561_v23  ;;  %v1882_v23 = vld [vmem:[#allocation12 + $0xc8] sm:$0xff] }
 0x429   :  { %2324 = vmatprep.subr.mxu1 %v2559_v14 }
 0x42a   :  { %2325 = vmatpush3.msra.mxu1 %v1560_v24  ;;  %v1881_v24 = vld [vmem:[#allocation12 + $0xc0] sm:$0xff] }
 0x42b   :  { %2326 = vmatprep.subr.mxu1 %v2559_v14 }
 0x42c   :  { %2327 = vmatpush3.msra.mxu1 %v1559_v25  ;;  %v1865_v25 = vld [vmem:[#allocation12 + $0x40] sm:$0xff] }
 0x42d   :  { %2329 = vmatmul.mubr.f32.vlgmr.msra.gmra.mxu1 %v1004_v36  ;;  %2158 = vmatprep.subr.mxu1 %v1888_v12  ;;  %v1880_v36 = vld [vmem:[#allocation12 + $0xb8] sm:$0xff] }
 0x42e   :  { %2159 = vmatpush3.msra.mxu1 %v1872_v13 }
 0x42f   :  { %2160 = vmatprep.subr.mxu1 %v1887_v1 }
 0x430   :  { %2161 = vmatpush3.msra.mxu1 %v1871_v52 }
 0x431   :  { %2162 = vmatprep.subr.mxu1 %v1886_v15 }
 0x432   :  { %2163 = vmatpush3.msra.mxu1 %v1870_v17 }
 0x433   :  { %2164 = vmatprep.subr.mxu1 %v1885_v18 }
 0x434   :  { %2165 = vmatpush3.msra.mxu1 %v1869_v19 }
 0x435   :  { %2166 = vmatprep.subr.mxu1 %v1884_v61 }
 0x436   :  { %2167 = vmatpush3.msra.mxu1 %v1868_v20 }
 0x437   :  { %2168 = vmatprep.subr.mxu1 %v1883_v21 }
 0x438   :  { %2169 = vmatpush3.msra.mxu1 %v1867_v22 }
 0x439   :  { %2170 = vmatprep.subr.mxu1 %v1882_v23 }
 0x43a   :  { %2171 = vmatpush3.msra.mxu1 %v1866_v33 }
 0x43b   :  { %2172 = vmatprep.subr.mxu1 %v1881_v24 }
 0x43c   :  { %2173 = vmatpush3.msra.mxu1 %v1865_v25 }
 0x43d   :  { %2174 = vmatprep.subr.mxu1 %v1880_v36 }
 0x43e   :  { %2175 = vmatpush3.msra.mxu1 %v1864_v62 }
 0x43f   :  { %2176 = vmatprep.subr.mxu1 %v1879_v0 }
 0x440   :  { %2177 = vmatpush3.msra.mxu1 %v1863_v11 }
 0x441   :  { %2178 = vmatprep.subr.mxu1 %v1878_v27 }
 0x442   :  { %2179 = vmatpush3.msra.mxu1 %v1862_v42 }
 0x443   :  { %2180 = vmatprep.subr.mxu1 %v1877_v29 }
 0x4cd   :  { %v2121_v30 = vpop.f32.mrf.mxu1 }
 0x4cf   :  { %v2122_v34 = vpop.f32.mrf.mxu1 }
 0x4d0   :  { %v2123_v47 = vadd.f32 %v2122_v34, %v2121_v30  ;;  %v1861_v30 = vld [vmem:[#allocation12 + $0x20] sm:$0xff] }
 0x4d1   :  { %2181 = vmatpush3.msra.mxu1 %v1861_v30  ;;  %v2011_v34 = vld [vmem:[%s3269_s16] ss:$0 sm:$0xff] }
 0x4d2   :  { %v1555_v54 = vadd.f32 %v2123_v47, %v2010_v31 }
 0x4d4   :  { %v1558_v41 = vmax.f32 %v1555_v54, 0.0 }
 0x4d6   :  { %2294 = vmatmul.mubr.f32.vlgmr.msra.gmra.mxu0 %v1558_v41 }
 0x4d7   :  { %1785 = vmatpush1.msra.mxu0 %v1770_v37  ;;  %1848 = vmatprep.mubr.f32.mxu0 %v2559_v14  ;;  %v1757_v14 = vld [vmem:[#allocation10 + $0x88] sm:$0xff] }
 0x4d8   :  { %1786 = vmatprep.subr.mxu0 %v1769_v38  ;;  %v1876_v38 = vld [vmem:[#allocation12 + $0x98] sm:$0xff] }
 0x4d9   :  { %1787 = vmatpush1.msra.mxu0 %v1768_v2  ;;  %2182 = vmatprep.subr.mxu1 %v1876_v38  ;;  %v1860_v2 = vld [vmem:[#allocation12 + $0x18] sm:$0xff] }
 0x4da   :  { %1788 = vmatprep.subr.mxu0 %v1767_v40  ;;  %2183 = vmatpush3.msra.mxu1 %v1860_v2  ;;  %v1875_v40 = vld [vmem:[#allocation12 + $0x90] sm:$0xff] }
 0x4db   :  { %1789 = vmatpush1.msra.mxu0 %v1766_v43  ;;  %2184 = vmatprep.subr.mxu1 %v1875_v40  ;;  %v1859_v43 = vld [vmem:[#allocation12 + $0x10] sm:$0xff] }
 0x4dc   :  { %1790 = vmatprep.subr.mxu0 %v1765_v3  ;;  %2185 = vmatpush3.msra.mxu1 %v1859_v43  ;;  %v1874_v3 = vld [vmem:[#allocation12 + $0x88] sm:$0xff] }
 0x4dd   :  { %1791 = vmatpush1.msra.mxu0 %v1764_v35  ;;  %2186 = vmatprep.subr.mxu1 %v1874_v3  ;;  %v1858_v35 = vld [vmem:[#allocation12 + $0x8] sm:$0xff] }
 0x4de   :  { %1792 = vmatprep.subr.mxu0 %v1763_v45  ;;  %v1873_v45 = vld [vmem:[#allocation12 + $0x80] sm:$0xff]  ;;  %2187 = vmatpush3.msra.mxu1 %v1858_v35 }
 0x4df   :  { %1793 = vmatpush1.msra.mxu0 %v1762_v44  ;;  %v1857_v44 = vld [vmem:[#allocation12] sm:$0xff]  ;;  %2188 = vmatprep.subr.mxu1 %v1873_v45 }
 0x4e0   :  { %1794 = vmatprep.subr.mxu0 %v1761_v49  ;;  %2189 = vmatpush3.msra.mxu1 %v1857_v44  ;;  %v1772_v49 = vld [vmem:[%s3271_s18] sm:$0x3] }
 0x4e1   :  { %1795 = vmatpush1.msra.mxu0 %v1760_v46  ;;  %v1777_v46 = vrot.slane %v1772_v49, %v2826_v28  ;;  %v2013_v28 = vld [vmem:[%s3274_s21] ss:$0 sm:$0xff] }
 0x4e2   :  { %1796 = vmatprep.subr.mxu0 %v1759_v48  ;;  %v1781_v48 = vrot.slane %v1772_v49, %v2832_v32 }
 0x4e3   :  { %1797 = vmatpush1.msra.mxu0 %v1758_v53 }
 0x4e4   :  { %1798 = vmatprep.subr.mxu0 %v1757_v14 }
 0x4e5   :  { %1799 = vmatpush1.msra.mxu0 %v1756_v7 }
 0x4e6   :  { %1800 = vmatprep.subr.mxu0 %v1755_v50 }
 0x4e7   :  { %1801 = vmatpush1.msra.mxu0 %v1754_v51 }
 0x4e8   :  { %1802 = vmatprep.subr.mxu0 %v1753_v55 }
 0x4e9   :  { %1803 = vmatpush1.msra.mxu0 %v1752_v5 }
 0x4ea   :  { %1804 = vmatprep.subr.mxu0 %v1751_v60  ;;  %v2012_v60 = vld [vmem:[%s3273_s20] ss:$0 sm:$0xff] }
 0x4eb   :  { %1805 = vmatpush1.msra.mxu0 %v1750_v16 }
 0x4ec   :  { %1806 = vmatprep.subr.mxu0 %v1749_v57 }
 0x4ed   :  { %v3233_v59 = vpop.f32.mrf.mxu1  ;;  %1807 = vmatpush1.msra.mxu0 %v1748_v58 }
 0x4ee   :  { %1808 = vmatprep.subr.mxu0 %v1747_v63 }
 0x4ef   :  { %v2330_v4 = vpop.f32.mrf.mxu1  ;;  %1809 = vmatpush1.msra.mxu0 %v1746_v56 }
 0x4f0   :  { %1810 = vmatprep.subr.mxu0 %v1745_v26 }
 0x4f1   :  { %1811 = vmatpush1.msra.mxu0 %v1744_v39 }
 0x4f2   :  { %1812 = vmatprep.subr.mxu0 %v1743_v6 }
 0x4f3   :  { %1813 = vmatpush1.msra.mxu0 %v1742_v8 }
 0x4f4   :  { %1814 = vmatprep.subr.mxu0 %v1741_v9 }
 0x4f5   :  { %1815 = vmatpush1.msra.mxu0 %v1740_v10 }
 0x596   :  { %v1657_v31 = vpop.f32.mrf.mxu0 }
 0x597   :  { %v1728_v47 = vadd.f32 %v3233_v59, %v1657_v31 }
 0x598   :  { %v2295_v54 = vpop.f32.mrf.mxu0 }
 0x599   :  { %v1738_v41 = vadd.f32 %v2011_v34, %v1728_v47 }
 0x59b   :  { %v1739_v37 = vmax.f32 %v1738_v41, 0.0 }
 0x59d   :  { %1849 = vmatmul.mubr.f32.vlgmr.msra.gmra.mxu0 %v1739_v37 }
 0x65d   :  { %v1850_v53 = vpop.f32.mrf.mxu0 }
 0x65e   :  { %v1851_v14 = vadd.f32 %v1850_v53, %v1777_v46 }
 0x65f   :  { %v1852_v7 = vpop.f32.mrf.mxu0 }
 0x660   :  { %v1853_v50 = vadd.f32 %v1852_v7, %v1781_v48  ;;  %v1855_v55 = vmax.f32 %v1851_v14, 0.0 }
 0x662   :  { %v1856_v51 = vmax.f32 %v1853_v50, 0.0 }
 0x664   :  { %1960 = vmatprep.mubr.f32.mxu1 %v1856_v51 }
 0x665   :  { %1961 = vmatmul.mubr.f32.vlgmr.msra.gmra.mxu1 %v1855_v55 }
 0x725   :  { %v2190_v5 = vpop.f32.mrf.mxu1 }
 0x727   :  { %v2191_v16 = vpop.f32.mrf.mxu1 }
 0x728   :  { %v2192_v57 = vadd.f32 %v2191_v16, %v2190_v5 }
 0x72a   :  { %v1963_v32 = vadd.f32 %v2192_v57, %v2012_v60 }
 0x72c   :  { %v1973_v58 = vadd.f32 %v2013_v28, %v1963_v32 }
 0x72e   :  { %1974 = vst [vmem:[%s3275_s22] sm:$0x3] %v1973_v58 }
 0x72f   :  { %1979 = vsyncpa [#allocation3], 1 }
 0x730   :  { %1980 = vsyncpa [#allocation5], 1 }
 0x731   :  { %1981 = vsyncpa [#allocation8], 1 }
 0x732   :  { %1982 = vsyncpa [#allocation11], 1 }

</bundles_post_ra>
